<compile_context>
chip_gen: v6e
topology: v6e:2x2x1
jax: 0.10.0
libtpu: 0.0.40
codegen_flags: <defaults>
</compile_context>

<pallas_src>
import jax
import jax.numpy as jnp
from jax.experimental import pallas as pl
from jax.experimental.pallas import tpu as pltpu


# ---------------------------------------------------------------------------
# Helpers (plain JAX glue)
# ---------------------------------------------------------------------------
def _fold_bn(gamma, beta, mean, var, eps=1e-5):
    scale = gamma / jnp.sqrt(var + eps)
    bias = beta - mean * scale
    return (scale.reshape(1, -1).astype(jnp.float32),
            bias.reshape(1, -1).astype(jnp.float32))


def channel_concatenate(x, out):
    # PyTorch cat along channel dim (dim=1 in NCHW) == last dim in NHWC.
    return jnp.concatenate([x, out], axis=-1)


def channel_shuffle(x, groups):
    # Faithful to the PyTorch reference: `torch.transpose(x, 1, 2).contiguous()`
    # is never assigned, so the function is an identity view round-trip.
    n, h, w, c = x.shape
    x5 = x.reshape(n, h, w, groups, c // groups)
    _ = jnp.swapaxes(x5, 3, 4)  # computed-and-dropped, as in the reference
    return x5.reshape(n, h, w, c)


# ---------------------------------------------------------------------------
# Fast kernel: branch half only, lane-dense C (C % 128 == 0), roll-based dx
# shifts, H-only padded scratch.  x_ref / o_ref are (B, H, W, C) blocks.
# ---------------------------------------------------------------------------
def _branch_kernel_fast(x_ref, w1_ref, b1_ref, wdw_ref, w2_ref, b3_ref,
                        mnf_ref, mnl_ref, o_ref, pad_ref):
    B, H, W, C = x_ref.shape
    M = B * H * W

    # --- ConvPointWise #1 (1x1, BN scale folded) + ReLU — MXU matmul ---
    h = jnp.dot(x_ref[...].reshape(M, C), w1_ref[...],
                preferred_element_type=jnp.float32)
    h = jnp.maximum(h + b1_ref[...], 0.0)

    # H-only padded slab: zero just the two halo rows (O(perimeter)), interior
    # store is at W-offset 0 (sublane-aligned).  Re-zeroed every step so it
    # stays correct when the "parallel" batch axis is sharded across cores.
    pad_ref[:, 0:1, :, :] = jnp.zeros((B, 1, W, C), jnp.float32)
    pad_ref[:, H + 1:H + 2, :, :] = jnp.zeros((B, 1, W, C), jnp.float32)
    pad_ref[:, 1:H + 1, :, :] = h.reshape(B, H, W, C)

    # --- ConvDepthWise (3x3, stride 1, pad 1); BN scale folded into taps ---
    # dy taps: free address offsets along the (untiled) H axis of the scratch.
    # dx taps: one XLU roll per column-sum, reused across the 3 dy taps,
    #          with precomputed edge masks killing the wrapped column.
    w_all = wdw_ref[...]                          # (3, 3, C)
    tl = jnp.zeros((M, C), jnp.float32)           # left-column sum  (k[:,0])
    tc = jnp.zeros((M, C), jnp.float32)           # center-column sum(k[:,1])
    tr = jnp.zeros((M, C), jnp.float32)           # right-column sum (k[:,2])
    for dy in range(3):
        row = pad_ref[:, dy:dy + H, :, :].reshape(M, C)
        tl = tl + row * w_all[dy, 0].reshape(1, C)
        tc = tc + row * w_all[dy, 1].reshape(1, C)
        tr = tr + row * w_all[dy, 2].reshape(1, C)
    acc = (tc
           + pltpu.roll(tl, 1, axis=0) * mnf_ref[...]       # value at w-1
           + pltpu.roll(tr, M - 1, axis=0) * mnl_ref[...])  # value at w+1

    # --- ConvPointWise #2 (1x1, BN + folded depthwise-branch bias) + ReLU ---
    h2 = jnp.dot(acc, w2_ref[...], preferred_element_type=jnp.float32)
    h2 = jnp.maximum(h2 + b3_ref[...], 0.0)
    o_ref[...] = h2.reshape(B, H, W, C).astype(o_ref.dtype)


# ---------------------------------------------------------------------------
# Generic kernel: any C (used when C % 128 != 0).  Same math; padded-W scratch
# with halo-strip-only zeroing.  x_ref / o_ref are (B, H, W, C) blocks.
# ---------------------------------------------------------------------------
def _branch_kernel_generic(x_ref, w1_ref, b1_ref, wdw_ref, w2_ref, b3_ref,
                           o_ref, pad_ref):
    B, H, W, C = x_ref.shape
    M = B * H * W

    h = jnp.dot(x_ref[...].reshape(M, C), w1_ref[...],
                preferred_element_type=jnp.float32)
    h = jnp.maximum(h + b1_ref[...], 0.0)

    # Zero only the halo strips (top/bottom rows, left/right columns).
    pad_ref[:, 0:1, :, :] = jnp.zeros((B, 1, W + 2, C), jnp.float32)
    pad_ref[:, H + 1:H + 2, :, :] = jnp.zeros((B, 1, W + 2, C), jnp.float32)
    pad_ref[:, 1:H + 1, 0:1, :] = jnp.zeros((B, H, 1, C), jnp.float32)
    pad_ref[:, 1:H + 1, W + 1:W + 2, :] = jnp.zeros((B, H, 1, C), jnp.float32)
    pad_ref[:, 1:H + 1, 1:W + 1, :] = h.reshape(B, H, W, C)
    hp = pad_ref[...]                             # (B, H+2, W+2, C)

    w_all = wdw_ref[...]                          # (3, 3, C)
    acc = jnp.zeros((B, H, W, C), jnp.float32)
    for dy in range(3):
        for dx in range(3):
            acc = acc + hp[:, dy:dy + H, dx:dx + W, :] * \
                w_all[dy, dx].reshape(1, 1, 1, C)

    h2 = jnp.dot(acc.reshape(M, C), w2_ref[...],
                 preferred_element_type=jnp.float32)
    h2 = jnp.maximum(h2 + b3_ref[...], 0.0)
    o_ref[...] = h2.reshape(B, H, W, C).astype(o_ref.dtype)


# ---------------------------------------------------------------------------
# Wrapper
# ---------------------------------------------------------------------------
def _pick_batch_tile(N, batch_tile):
    bt = max(1, min(batch_tile, N))
    if N >= 2:
        # >= 2 grid steps so v7x's two TensorCores both get work.
        bt = min(bt, max(1, N // 2))
    while N % bt:
        bt -= 1
    return bt


def shuffle_unit_v2_stride1(x, params, *, batch_tile=8):
    """ShuffleUnitv2 forward, stride=1 (in_c == out_c). x: (N, H, W, C_in) NHWC."""
    N, H, W, C2 = x.shape
    C = C2 // 2
    w1, s1, b1, wdw, s2, b2, w2, s3, b3 = params

    # Fold eval-mode BN (and the pre-pointwise bias b2) into conv weights.
    # bf16 x -> bf16 weights halves HBM traffic (accumulation stays f32).
    wdt = jnp.bfloat16 if x.dtype == jnp.bfloat16 else jnp.float32
    w1f = (w1 * s1).astype(wdt)                                # (C, C)
    b1f = b1.reshape(1, C).astype(jnp.float32)                 # (1, C)
    wdwf = (wdw * s2.reshape(1, 1, C)).astype(jnp.float32)     # (3, 3, C)
    w2f = (w2 * s3).astype(wdt)                                # (C, C)
    b3f = (b3 + (b2.reshape(1, C) @ w2) * s3).reshape(1, C).astype(jnp.float32)

    B = _pick_batch_tile(N, batch_tile)
    M = B * H * W
    Hp = H + 2

    wspecs = [
        pl.BlockSpec((C, C), lambda n: (0, 0)),
        pl.BlockSpec((1, C), lambda n: (0, 0)),
        pl.BlockSpec((3, 3, C), lambda n: (0, 0, 0)),
        pl.BlockSpec((C, C), lambda n: (0, 0)),
        pl.BlockSpec((1, C), lambda n: (0, 0)),
    ]
    # Raise the scoped-VMEM default (16 MiB v5e / 32 MiB v6e, v7x).  Tune per
    # generation: grow batch_tile toward ~100 MiB on v6e, shrink on v7x (64 MiB).
    cparams = pltpu.CompilerParams(
        dimension_semantics=("parallel",),
        vmem_limit_bytes=64 * 1024 * 1024,
    )

    use_fast = (C % 128 == 0) and (W % 8 == 0)
    if use_fast:
        # Edge masks for the roll-based dx shifts: per-row w position within
        # one (B, H, W) block (same for every grid step), built on the host.
        wm = jnp.arange(M, dtype=jnp.int32) % W
        mask_nf = (wm != 0).astype(jnp.float32).reshape(M, 1)      # kill w == 0
        mask_nl = (wm != W - 1).astype(jnp.float32).reshape(M, 1)  # kill w == W-1

        # Aliased path: the output buffer IS the input buffer; the kernel reads
        # and writes only channel block 1 (the branch half), so the
        # pass-through half never leaves HBM and is never re-stored.
        out = pl.pallas_call(
            _branch_kernel_fast,
            out_shape=jax.ShapeDtypeStruct((N, H, W, C2), x.dtype),
            grid_spec=pltpu.PrefetchScalarGridSpec(
                num_scalar_prefetch=0,
                grid=(N // B,),
                in_specs=[pl.BlockSpec((B, H, W, C), lambda n: (n, 0, 0, 1))]
                + wspecs
                + [pl.BlockSpec((M, 1), lambda n: (0, 0)),
                   pl.BlockSpec((M, 1), lambda n: (0, 0))],
                out_specs=pl.BlockSpec((B, H, W, C), lambda n: (n, 0, 0, 1)),
                scratch_shapes=[pltpu.VMEM((B, Hp, W, C), jnp.float32)],
            ),
            input_output_aliases={0: 0},
            compiler_params=cparams,
        )(x, w1f, b1f, wdwf, w2f, b3f, mask_nf, mask_nl)
    else:
        # Fallback for C % 128 != 0 (e.g. real ShuffleNetV2 widths 58/116/232):
        # pre-split in the wrapper, run the kernel on x_last only, concat at
        # the XLA level.  TODO(synk): optionally zero-pad C to 128 for a
        # lane-dense MXU / store path at these widths.
        x_first = x[..., :C]
        x_last = x[..., C:]
        branch = pl.pallas_call(
            _branch_kernel_generic,
            out_shape=jax.ShapeDtypeStruct((N, H, W, C), x.dtype),
            grid_spec=pltpu.PrefetchScalarGridSpec(
                num_scalar_prefetch=0,
                grid=(N // B,),
                in_specs=[pl.BlockSpec((B, H, W, C), lambda n: (n, 0, 0, 0))]
                + wspecs,
                out_specs=pl.BlockSpec((B, H, W, C), lambda n: (n, 0, 0, 0)),
                scratch_shapes=[pltpu.VMEM((B, Hp, W + 2, C), jnp.float32)],
            ),
            compiler_params=cparams,
        )(x_last, w1f, b1f, wdwf, w2f, b3f)
        out = jnp.concatenate([x_first, branch], axis=-1)

    # Identity round-trip (faithful to the reference's dropped transpose).
    return channel_shuffle(out, 2)


# ---------------------------------------------------------------------------
# Pure-JAX reference (uses the UN-folded parameters; checks the folding too)
# ---------------------------------------------------------------------------
def ref_shuffle_unit_v2_stride1(x, params):
    w1, s1, b1, wdw, s2, b2, w2, s3, b3 = params
    C = x.shape[-1] // 2
    x_first, x_last = x[..., :C], x[..., C:]
    hi = jax.lax.Precision.HIGHEST
    h = jnp.einsum('nhwc,cd->nhwd', x_last, w1, precision=hi)
    h = jnp.maximum(h * s1 + b1, 0.0)
    dw = jax.lax.conv_general_dilated(
        h, wdw.reshape(3, 3, 1, C), window_strides=(1, 1),
        padding=((1, 1), (1, 1)),
        dimension_numbers=('NHWC', 'HWIO', 'NHWC'),
        feature_group_count=C, precision=hi)
    dw = dw * s2 + b2
    h2 = jnp.einsum('nhwc,cd->nhwd', dw, w2, precision=hi)
    h2 = jnp.maximum(h2 * s3 + b3, 0.0)
    return channel_shuffle(channel_concatenate(x_first, h2), 2)


# ---------------------------------------------------------------------------
# Demo
# ---------------------------------------------------------------------------
def _make_params(key, C):
    ks = jax.random.split(key, 6)

    def bn_params(k):
        k1, k2, k3, k4 = jax.random.split(k, 4)
        gamma = 1.0 + 0.2 * jax.random.normal(k1, (C,), jnp.float32)
        beta = 0.1 * jax.random.normal(k2, (C,), jnp.float32)
        mean = 0.1 * jax.random.normal(k3, (C,), jnp.float32)
        var = 1.0 + 0.2 * jax.random.uniform(k4, (C,), jnp.float32)
        return _fold_bn(gamma, beta, mean, var)

    w1 = 0.2 * jax.random.normal(ks[0], (C, C), jnp.float32)      # pw1 (Cin, Cout)
    s1, b1 = bn_params(ks[1])
    wdw = 0.2 * jax.random.normal(ks[2], (3, 3, C), jnp.float32)  # depthwise weight
    s2, b2 = bn_params(ks[3])
    w2 = 0.2 * jax.random.normal(ks[4], (C, C), jnp.float32)      # pw2 (Cin, Cout)
    s3, b3 = bn_params(ks[5])
    return (w1, s1, b1, wdw, s2, b2, w2, s3, b3)


if __name__ == "__main__":
    base_key = jax.random.PRNGKey(0)

    def run_case(key, N, H, W, in_c, tag):
        C = in_c // 2
        kx, kp = jax.random.split(key)
        x = jax.random.normal(kx, (N, H, W, in_c), jnp.float32)
        params = _make_params(kp, C)

        fwd = jax.jit(shuffle_unit_v2_stride1)
        out = jax.block_until_ready(fwd(x, params))
        ref = jax.block_until_ready(ref_shuffle_unit_v2_stride1(x, params))

        assert out.shape == (N, H, W, in_c), (tag, out.shape)
        if not jnp.allclose(out, ref, atol=2e-2, rtol=2e-2):
            err = float(jnp.max(jnp.abs(out - ref)))
            raise AssertionError(
                f"{tag}: Pallas output does not match JAX reference "
                f"(max abs err = {err})")

    k1, k2 = jax.random.split(base_key)
    # Fast path: per-branch C = 128 (lane-dense) -> aliased in/out, roll-based
    # depthwise, H-only padded scratch.
    run_case(k1, N=4, H=8, W=8, in_c=256, tag="aliased/C=128")
    # Generic path: per-branch C = 16 (< 128) -> pre-split + XLA concat.
    run_case(k2, N=2, H=8, W=8, in_c=32, tag="fallback/C=16")

    print("KERNEL_OK")
</pallas_src>

<mosaic_0001>
module attributes {stable_mosaic.version = 11 : i64} {
  func.func @_branch_kernel_fast(%arg0: i32, %arg1: memref<2x8x8x128xf32, #tpu.memory_space<vmem>>, %arg2: memref<128x128xf32, #tpu.memory_space<vmem>>, %arg3: memref<1x128xf32, #tpu.memory_space<vmem>>, %arg4: memref<3x3x128xf32, #tpu.memory_space<vmem>>, %arg5: memref<128x128xf32, #tpu.memory_space<vmem>>, %arg6: memref<1x128xf32, #tpu.memory_space<vmem>>, %arg7: memref<128x1xf32, #tpu.memory_space<vmem>>, %arg8: memref<128x1xf32, #tpu.memory_space<vmem>>, %arg9: memref<2x8x8x128xf32, #tpu.memory_space<vmem>>, %arg10: memref<2x10x8x128xf32, #tpu.memory_space<vmem>>) attributes {dimension_semantics = [#tpu.dimension_semantics<parallel>], iteration_bounds = array<i64: 2>, scalar_prefetch = 0 : i64, scratch_operands = 1 : i64, tpu.core_type = #tpu.core_type<tc>, window_params = [{transform_indices = @transform_0, window_bounds = array<i64: 2, 8, 8, 128>}, {pipeline_mode = #tpu.pipeline_mode<synchronous>, transform_indices = @transform_1, window_bounds = array<i64: 128, 128>}, {pipeline_mode = #tpu.pipeline_mode<synchronous>, transform_indices = @transform_2, window_bounds = array<i64: 1, 128>}, {pipeline_mode = #tpu.pipeline_mode<synchronous>, transform_indices = @transform_3, window_bounds = array<i64: 3, 3, 128>}, {pipeline_mode = #tpu.pipeline_mode<synchronous>, transform_indices = @transform_4, window_bounds = array<i64: 128, 128>}, {pipeline_mode = #tpu.pipeline_mode<synchronous>, transform_indices = @transform_5, window_bounds = array<i64: 1, 128>}, {pipeline_mode = #tpu.pipeline_mode<synchronous>, transform_indices = @transform_6, window_bounds = array<i64: 128, 1>}, {pipeline_mode = #tpu.pipeline_mode<synchronous>, transform_indices = @transform_7, window_bounds = array<i64: 128, 1>}, {transform_indices = @transform_8, window_bounds = array<i64: 2, 8, 8, 128>}]} {
    %c0 = arith.constant 0 : index
    %c0_0 = arith.constant 0 : index
    %c0_1 = arith.constant 0 : index
    %c0_2 = arith.constant 0 : index
    %0 = vector.load %arg1[%c0, %c0_0, %c0_1, %c0_2] : memref<2x8x8x128xf32, #tpu.memory_space<vmem>>, vector<2x8x8x128xf32>
    %1 = vector.shape_cast %0 : vector<2x8x8x128xf32> to vector<128x128xf32>
    %c0_3 = arith.constant 0 : index
    %c0_4 = arith.constant 0 : index
    %2 = vector.load %arg2[%c0_3, %c0_4] : memref<128x128xf32, #tpu.memory_space<vmem>>, vector<128x128xf32>
    %cst = arith.constant dense<0.000000e+00> : vector<128x128xf32>
    %3 = tpu.matmul %1, %2, %cst {dimension_numbers = #tpu.dot_dimension_numbers<[1], [0], [0], [1], [0, 0, 1, 1], [], []>} : vector<128x128xf32>, vector<128x128xf32>, vector<128x128xf32> -> vector<128x128xf32>
    %c0_5 = arith.constant 0 : index
    %c0_6 = arith.constant 0 : index
    %4 = vector.load %arg3[%c0_5, %c0_6] : memref<1x128xf32, #tpu.memory_space<vmem>>, vector<1x128xf32>
    %5 = vector.broadcast %4 : vector<1x128xf32> to vector<128x128xf32>
    %6 = arith.addf %3, %5 : vector<128x128xf32>
    %cst_7 = arith.constant 0.000000e+00 : f32
    %7 = vector.broadcast %cst_7 : f32 to vector<128x128xf32>
    %8 = arith.maximumf %6, %7 : vector<128x128xf32>
    %cst_8 = arith.constant 0.000000e+00 : f32
    %9 = vector.broadcast %cst_8 : f32 to vector<2x1x8x128xf32>
    %c0_9 = arith.constant 0 : index
    %c0_10 = arith.constant 0 : index
    %c0_11 = arith.constant 0 : index
    %c0_12 = arith.constant 0 : index
    %10 = vector.load %arg10[%c0_9, %c0_10, %c0_11, %c0_12] : memref<2x10x8x128xf32, #tpu.memory_space<vmem>>, vector<2x1x8x128xf32>
    tpu.vector_store %arg10[%c0_9, %c0_10, %c0_11, %c0_12], %9 {strides = array<i32>} : memref<2x10x8x128xf32, #tpu.memory_space<vmem>>, vector<2x1x8x128xf32>,
    %cst_13 = arith.constant 0.000000e+00 : f32
    %11 = vector.broadcast %cst_13 : f32 to vector<2x1x8x128xf32>
    %c0_14 = arith.constant 0 : index
    %c9 = arith.constant 9 : index
    %c0_15 = arith.constant 0 : index
    %c0_16 = arith.constant 0 : index
    %12 = vector.load %arg10[%c0_14, %c9, %c0_15, %c0_16] : memref<2x10x8x128xf32, #tpu.memory_space<vmem>>, vector<2x1x8x128xf32>
    tpu.vector_store %arg10[%c0_14, %c9, %c0_15, %c0_16], %11 {strides = array<i32>} : memref<2x10x8x128xf32, #tpu.memory_space<vmem>>, vector<2x1x8x128xf32>,
    %13 = vector.shape_cast %8 : vector<128x128xf32> to vector<2x8x8x128xf32>
    %c0_17 = arith.constant 0 : index
    %c1 = arith.constant 1 : index
    %c0_18 = arith.constant 0 : index
    %c0_19 = arith.constant 0 : index
    %14 = vector.load %arg10[%c0_17, %c1, %c0_18, %c0_19] : memref<2x10x8x128xf32, #tpu.memory_space<vmem>>, vector<2x8x8x128xf32>
    tpu.vector_store %arg10[%c0_17, %c1, %c0_18, %c0_19], %13 {strides = array<i32>} : memref<2x10x8x128xf32, #tpu.memory_space<vmem>>, vector<2x8x8x128xf32>,
    %c0_20 = arith.constant 0 : index
    %c0_21 = arith.constant 0 : index
    %c0_22 = arith.constant 0 : index
    %15 = vector.load %arg4[%c0_20, %c0_21, %c0_22] : memref<3x3x128xf32, #tpu.memory_space<vmem>>, vector<3x3x128xf32>
    %cst_23 = arith.constant 0.000000e+00 : f32
    %16 = vector.broadcast %cst_23 : f32 to vector<128x128xf32>
    %cst_24 = arith.constant 0.000000e+00 : f32
    %17 = vector.broadcast %cst_24 : f32 to vector<128x128xf32>
    %cst_25 = arith.constant 0.000000e+00 : f32
    %18 = vector.broadcast %cst_25 : f32 to vector<128x128xf32>
    %c0_26 = arith.constant 0 : index
    %c0_27 = arith.constant 0 : index
    %c0_28 = arith.constant 0 : index
    %c0_29 = arith.constant 0 : index
    %19 = vector.load %arg10[%c0_26, %c0_27, %c0_28, %c0_29] : memref<2x10x8x128xf32, #tpu.memory_space<vmem>>, vector<2x8x8x128xf32>
    %20 = vector.shape_cast %19 : vector<2x8x8x128xf32> to vector<128x128xf32>
    %21 = vector.extract_strided_slice %15 {offsets = [0, 0, 0], sizes = [1, 1, 128], strides = [1, 1, 1]} : vector<3x3x128xf32> to vector<1x1x128xf32>
    %22 = vector.shape_cast %21 : vector<1x1x128xf32> to vector<128xf32>
    %23 = vector.shape_cast %22 : vector<128xf32> to vector<1x128xf32>
    %24 = vector.broadcast %23 : vector<1x128xf32> to vector<128x128xf32>
    %25 = arith.mulf %20, %24 : vector<128x128xf32>
    %26 = arith.addf %16, %25 : vector<128x128xf32>
    %27 = vector.extract_strided_slice %15 {offsets = [0, 1, 0], sizes = [1, 1, 128], strides = [1, 1, 1]} : vector<3x3x128xf32> to vector<1x1x128xf32>
    %28 = vector.shape_cast %27 : vector<1x1x128xf32> to vector<128xf32>
    %29 = vector.shape_cast %28 : vector<128xf32> to vector<1x128xf32>
    %30 = vector.broadcast %29 : vector<1x128xf32> to vector<128x128xf32>
    %31 = arith.mulf %20, %30 : vector<128x128xf32>
    %32 = arith.addf %17, %31 : vector<128x128xf32>
    %33 = vector.extract_strided_slice %15 {offsets = [0, 2, 0], sizes = [1, 1, 128], strides = [1, 1, 1]} : vector<3x3x128xf32> to vector<1x1x128xf32>
    %34 = vector.shape_cast %33 : vector<1x1x128xf32> to vector<128xf32>
    %35 = vector.shape_cast %34 : vector<128xf32> to vector<1x128xf32>
    %36 = vector.broadcast %35 : vector<1x128xf32> to vector<128x128xf32>
    %37 = arith.mulf %20, %36 : vector<128x128xf32>
    %38 = arith.addf %18, %37 : vector<128x128xf32>
    %c0_30 = arith.constant 0 : index
    %c1_31 = arith.constant 1 : index
    %c0_32 = arith.constant 0 : index
    %c0_33 = arith.constant 0 : index
    %39 = vector.load %arg10[%c0_30, %c1_31, %c0_32, %c0_33] : memref<2x10x8x128xf32, #tpu.memory_space<vmem>>, vector<2x8x8x128xf32>
    %40 = vector.shape_cast %39 : vector<2x8x8x128xf32> to vector<128x128xf32>
    %41 = vector.extract_strided_slice %15 {offsets = [1, 0, 0], sizes = [1, 1, 128], strides = [1, 1, 1]} : vector<3x3x128xf32> to vector<1x1x128xf32>
    %42 = vector.shape_cast %41 : vector<1x1x128xf32> to vector<128xf32>
    %43 = vector.shape_cast %42 : vector<128xf32> to vector<1x128xf32>
    %44 = vector.broadcast %43 : vector<1x128xf32> to vector<128x128xf32>
    %45 = arith.mulf %40, %44 : vector<128x128xf32>
    %46 = arith.addf %26, %45 : vector<128x128xf32>
    %47 = vector.extract_strided_slice %15 {offsets = [1, 1, 0], sizes = [1, 1, 128], strides = [1, 1, 1]} : vector<3x3x128xf32> to vector<1x1x128xf32>
    %48 = vector.shape_cast %47 : vector<1x1x128xf32> to vector<128xf32>
    %49 = vector.shape_cast %48 : vector<128xf32> to vector<1x128xf32>
    %50 = vector.broadcast %49 : vector<1x128xf32> to vector<128x128xf32>
    %51 = arith.mulf %40, %50 : vector<128x128xf32>
    %52 = arith.addf %32, %51 : vector<128x128xf32>
    %53 = vector.extract_strided_slice %15 {offsets = [1, 2, 0], sizes = [1, 1, 128], strides = [1, 1, 1]} : vector<3x3x128xf32> to vector<1x1x128xf32>
    %54 = vector.shape_cast %53 : vector<1x1x128xf32> to vector<128xf32>
    %55 = vector.shape_cast %54 : vector<128xf32> to vector<1x128xf32>
    %56 = vector.broadcast %55 : vector<1x128xf32> to vector<128x128xf32>
    %57 = arith.mulf %40, %56 : vector<128x128xf32>
    %58 = arith.addf %38, %57 : vector<128x128xf32>
    %c0_34 = arith.constant 0 : index
    %c2 = arith.constant 2 : index
    %c0_35 = arith.constant 0 : index
    %c0_36 = arith.constant 0 : index
    %59 = vector.load %arg10[%c0_34, %c2, %c0_35, %c0_36] : memref<2x10x8x128xf32, #tpu.memory_space<vmem>>, vector<2x8x8x128xf32>
    %60 = vector.shape_cast %59 : vector<2x8x8x128xf32> to vector<128x128xf32>
    %61 = vector.extract_strided_slice %15 {offsets = [2, 0, 0], sizes = [1, 1, 128], strides = [1, 1, 1]} : vector<3x3x128xf32> to vector<1x1x128xf32>
    %62 = vector.shape_cast %61 : vector<1x1x128xf32> to vector<128xf32>
    %63 = vector.shape_cast %62 : vector<128xf32> to vector<1x128xf32>
    %64 = vector.broadcast %63 : vector<1x128xf32> to vector<128x128xf32>
    %65 = arith.mulf %60, %64 : vector<128x128xf32>
    %66 = arith.addf %46, %65 : vector<128x128xf32>
    %67 = vector.extract_strided_slice %15 {offsets = [2, 1, 0], sizes = [1, 1, 128], strides = [1, 1, 1]} : vector<3x3x128xf32> to vector<1x1x128xf32>
    %68 = vector.shape_cast %67 : vector<1x1x128xf32> to vector<128xf32>
    %69 = vector.shape_cast %68 : vector<128xf32> to vector<1x128xf32>
    %70 = vector.broadcast %69 : vector<1x128xf32> to vector<128x128xf32>
    %71 = arith.mulf %60, %70 : vector<128x128xf32>
    %72 = arith.addf %52, %71 : vector<128x128xf32>
    %73 = vector.extract_strided_slice %15 {offsets = [2, 2, 0], sizes = [1, 1, 128], strides = [1, 1, 1]} : vector<3x3x128xf32> to vector<1x1x128xf32>
    %74 = vector.shape_cast %73 : vector<1x1x128xf32> to vector<128xf32>
    %75 = vector.shape_cast %74 : vector<128xf32> to vector<1x128xf32>
    %76 = vector.broadcast %75 : vector<1x128xf32> to vector<128x128xf32>
    %77 = arith.mulf %60, %76 : vector<128x128xf32>
    %78 = arith.addf %58, %77 : vector<128x128xf32>
    %c1_i32 = arith.constant 1 : i32
    %79 = tpu.dynamic_rotate %66 by %c1_i32 dim 0 : vector<128x128xf32>, i32 -> vector<128x128xf32>
    %c0_37 = arith.constant 0 : index
    %c0_38 = arith.constant 0 : index
    %80 = vector.load %arg7[%c0_37, %c0_38] : memref<128x1xf32, #tpu.memory_space<vmem>>, vector<128x1xf32>
    %81 = vector.broadcast %80 : vector<128x1xf32> to vector<128x128xf32>
    %82 = arith.mulf %79, %81 : vector<128x128xf32>
    %83 = arith.addf %72, %82 : vector<128x128xf32>
    %c127_i32 = arith.constant 127 : i32
    %84 = tpu.dynamic_rotate %78 by %c127_i32 dim 0 : vector<128x128xf32>, i32 -> vector<128x128xf32>
    %c0_39 = arith.constant 0 : index
    %c0_40 = arith.constant 0 : index
    %85 = vector.load %arg8[%c0_39, %c0_40] : memref<128x1xf32, #tpu.memory_space<vmem>>, vector<128x1xf32>
    %86 = vector.broadcast %85 : vector<128x1xf32> to vector<128x128xf32>
    %87 = arith.mulf %84, %86 : vector<128x128xf32>
    %88 = arith.addf %83, %87 : vector<128x128xf32>
    %c0_41 = arith.constant 0 : index
    %c0_42 = arith.constant 0 : index
    %89 = vector.load %arg5[%c0_41, %c0_42] : memref<128x128xf32, #tpu.memory_space<vmem>>, vector<128x128xf32>
    %cst_43 = arith.constant dense<0.000000e+00> : vector<128x128xf32>
    %90 = tpu.matmul %88, %89, %cst_43 {dimension_numbers = #tpu.dot_dimension_numbers<[1], [0], [0], [1], [0, 0, 1, 1], [], []>} : vector<128x128xf32>, vector<128x128xf32>, vector<128x128xf32> -> vector<128x128xf32>
    %c0_44 = arith.constant 0 : index
    %c0_45 = arith.constant 0 : index
    %91 = vector.load %arg6[%c0_44, %c0_45] : memref<1x128xf32, #tpu.memory_space<vmem>>, vector<1x128xf32>
    %92 = vector.broadcast %91 : vector<1x128xf32> to vector<128x128xf32>
    %93 = arith.addf %90, %92 : vector<128x128xf32>
    %cst_46 = arith.constant 0.000000e+00 : f32
    %94 = vector.broadcast %cst_46 : f32 to vector<128x128xf32>
    %95 = arith.maximumf %93, %94 : vector<128x128xf32>
    %96 = vector.shape_cast %95 : vector<128x128xf32> to vector<2x8x8x128xf32>
    %c0_47 = arith.constant 0 : index
    %c0_48 = arith.constant 0 : index
    %c0_49 = arith.constant 0 : index
    %c0_50 = arith.constant 0 : index
    %97 = vector.load %arg9[%c0_47, %c0_48, %c0_49, %c0_50] : memref<2x8x8x128xf32, #tpu.memory_space<vmem>>, vector<2x8x8x128xf32>
    tpu.vector_store %arg9[%c0_47, %c0_48, %c0_49, %c0_50], %96 {strides = array<i32>} : memref<2x8x8x128xf32, #tpu.memory_space<vmem>>, vector<2x8x8x128xf32>,
    return
  }
  func.func @transform_0(%arg0: i32) -> (i32, i32, i32, i32) {
    %c0_i32 = arith.constant 0 : i32
    %c0_i32_0 = arith.constant 0 : i32
    %c1_i32 = arith.constant 1 : i32
    %c0_i32_1 = arith.constant 0 : i32
    return %arg0, %c0_i32, %c0_i32_0, %c1_i32 : i32, i32, i32, i32
  }
  func.func @transform_1(%arg0: i32) -> (i32, i32) {
    %c0_i32 = arith.constant 0 : i32
    %c0_i32_0 = arith.constant 0 : i32
    %c0_i32_1 = arith.constant 0 : i32
    return %c0_i32, %c0_i32_0 : i32, i32
  }
  func.func @transform_2(%arg0: i32) -> (i32, i32) {
    %c0_i32 = arith.constant 0 : i32
    %c0_i32_0 = arith.constant 0 : i32
    %c0_i32_1 = arith.constant 0 : i32
    return %c0_i32, %c0_i32_0 : i32, i32
  }
  func.func @transform_3(%arg0: i32) -> (i32, i32, i32) {
    %c0_i32 = arith.constant 0 : i32
    %c0_i32_0 = arith.constant 0 : i32
    %c0_i32_1 = arith.constant 0 : i32
    %c0_i32_2 = arith.constant 0 : i32
    return %c0_i32, %c0_i32_0, %c0_i32_1 : i32, i32, i32
  }
  func.func @transform_4(%arg0: i32) -> (i32, i32) {
    %c0_i32 = arith.constant 0 : i32
    %c0_i32_0 = arith.constant 0 : i32
    %c0_i32_1 = arith.constant 0 : i32
    return %c0_i32, %c0_i32_0 : i32, i32
  }
  func.func @transform_5(%arg0: i32) -> (i32, i32) {
    %c0_i32 = arith.constant 0 : i32
    %c0_i32_0 = arith.constant 0 : i32
    %c0_i32_1 = arith.constant 0 : i32
    return %c0_i32, %c0_i32_0 : i32, i32
  }
  func.func @transform_6(%arg0: i32) -> (i32, i32) {
    %c0_i32 = arith.constant 0 : i32
    %c0_i32_0 = arith.constant 0 : i32
    %c0_i32_1 = arith.constant 0 : i32
    return %c0_i32, %c0_i32_0 : i32, i32
  }
  func.func @transform_7(%arg0: i32) -> (i32, i32) {
    %c0_i32 = arith.constant 0 : i32
    %c0_i32_0 = arith.constant 0 : i32
    %c0_i32_1 = arith.constant 0 : i32
    return %c0_i32, %c0_i32_0 : i32, i32
  }
  func.func @transform_8(%arg0: i32) -> (i32, i32, i32, i32) {
    %c0_i32 = arith.constant 0 : i32
    %c0_i32_0 = arith.constant 0 : i32
    %c1_i32 = arith.constant 1 : i32
    %c0_i32_1 = arith.constant 0 : i32
    return %arg0, %c0_i32, %c0_i32_0, %c1_i32 : i32, i32, i32, i32
  }
}

</mosaic_0001>

<bundles_post_ra>
// kernel: shuffle_unit_v2_stride1.1
= control target key start
LH: loop header
LB: loop body
LE: loop exit
PB: predicated region body
PF: predicated region fallthrough
CT: control target
= control target key end

     0   :  { %13 = vsyncpa [#allocation4], 0  ;;  %s2834_s0 = inlined_call_operand.hbm [shape: f32[4,8,8,256], index: 0, kind: input, shape index: {}, may-alias: {0,8}]   ;;  %s2835_s1 = inlined_call_operand.vmem [shape: f32[128,128], index: 1, kind: input, shape index: {}]   ;;  %s2836_s2 = inlined_call_operand.vmem [shape: f32[1,128], index: 2, kind: input, shape index: {}]   ;;  %s2837_s3 = inlined_call_operand.vmem [shape: f32[3,3,128], index: 3, kind: input, shape index: {}]   ;;  %s2838_s4 = inlined_call_operand.vmem [shape: f32[128,128], index: 4, kind: input, shape index: {}]   ;;  %s2839_s5 = inlined_call_operand.vmem [shape: f32[1,128], index: 5, kind: input, shape index: {}]   ;;  %s2840_s6 = inlined_call_operand.vmem [shape: f32[128,1], index: 6, kind: input, shape index: {}]   ;;  %s2841_s7 = inlined_call_operand.vmem [shape: f32[128,1], index: 7, kind: input, shape index: {}]   ;;  %s2842_s8 = inlined_call_operand.hbm [shape: f32[4,8,8,256], index: 8, kind: output, shape index: {}, may-alias: {0,8}]  }
   0x1   :  { %15 = vsyncpa [#allocation4 + $0x1], 0 }
   0x2   :  { %16 = vsyncpa [#allocation5], 0 }
   0x3   :  { %18 = vsyncpa [#allocation5 + $0x1], 0  ;;  %s1942_s27 = smov 0   ;;  %s1944_s28 = smov 0  }
   0x4   :  { %s1946_s29 = smov 0   ;;  %s1948_s30 = smov 0  }
   0x5 LB: > { %s1963_s9 = sadd.s32 4294967295, %s1886_s30   ;;  %s1543_s10 = sadd.s32 4294967294, %s1886_s30   ;;  %s1886_s30 = sphi %s1948_s30, %s2864_s30   ;;  %s1882_s29 = sphi %s1946_s29, %s2863_s29   ;;  %s1878_s28 = sphi %s1944_s28, %s2862_s28   ;;  %s1874_s27 = sphi %s1942_s27, %s2861_s27  }
   0x6   : > { %s1967_s11 = sadd.s32 1, %s1886_s30   ;;  %s31_s12 = sadd.s32 1, %s1882_s29 }
   0x7   : > { %s28_s13 = ssub.s32 %s1886_s30, %s1967_s11  ;;  %p38_p0 = scmp.ne.s32.totalorder %s1882_s29, %s1878_s28 }
   0x8   : > { %p29_p1 = scmp.eq.s32.totalorder %s28_s13, 0  ;;  %p39_p2 = scmp.eq.s32.totalorder %s1886_s30, 0 }
   0x9   : > { %p44_p3 = scmp.ne.s32.totalorder %s1878_s28, %s1874_s27  ;;  %p45_p4 = scmp.eq.s32.totalorder %s1963_s9, 0 }
   0xa   : > { %s1979_s14 = scalar_select %p29_p1, %s1882_s29, %s31_s12  }
   0xb   : > { %p1981_p5 = por %p39_p2, %p38_p0  ;;  %p1985_p6 = por %p45_p4, %p44_p3 }
   0xc   : > { %2847 = sst [smem:[#allocation9_spill]] %s1979_s14  ;;  %p215_p7 = scmp.eq.s32.totalorder %s1963_s9, 1 }
   0xd   : > { %s2849_s16 = scalar_select %p1985_p6, 1, 0 }
   0xe   : > { %p221_p8 = scmp.eq.s32.totalorder %s1543_s10, 1  ;;  %p1749_p10 = scmp.lt.s32.totalorder %s1886_s30, 2 }
   0xf   : > { %p1992_p11 = por %p215_p7, %p38_p0  ;;  %s262_s19 = sand.u32 1, %s1882_s29  }
  0x10   : > { %p1996_p12 = por %p221_p8, %p44_p3  ;;  %s1559_s20 = sshll.u32 %s1886_s30, 12 }
  0x11   : > { %s2850_s17 = scalar_select %p1992_p11, 1, 0 }
  0x12   : > { %s2851_s18 = scalar_select %p1996_p12, 1, 0 }
  0x13   : > { %s1546_s21 = sshll.u32 %s262_s19, 7  ;;  %s1498_s24 = scalar_lea.hbm %s2834_s0, %s1559_s20 }
  0x14   : > { %s2005_s25 = scalar_lea.hbm %s1498_s24, 128  ;;  %s266_s26 = scalar_lea.vmem [#allocation3], %s1546_s21 }
  0x15   : > { %s275_s10 = sshll.u32 %s266_s26, 4  ;;  %p2011_p13 = pnand %p1749_p10, %p1981_p5  ;;  %s2007_s10 = int_to_ptr.vmem [resolvable:$true] %s275_s10 }
  0x16   : > { %s2015_s13 = scalar_lea.sflag [#allocation4], %s262_s19  ;;  %s1820_s14 = scalar_lea.hbm %s1498_s24, 2176 }
  0x17   : > { %p1793_p0 = scmp.ne.s32.totalorder %s2005_s25, %s1820_s14  ;;  %p1794_p1 = pneg %p2011_p13 }
  0x18   : > { %s1797_s21 = scalar_lea.hbm %s2834_s0, 8192  ;;  %p1798_p4 = scmp.lt.s32.totalorder %s2005_s25, %s2834_s0 }
  0x19   : > { %p1795_p2 = pnand %p1794_p1, %p1793_p0  ;;  %p1799_p5 = scmp.lt.s32.totalorder %s1797_s21, %s1820_s14 }
  0x1b   : > { %p1796_p3 = pneg %p1795_p2  ;;  %p1800_p7 = por %p1799_p5, %p1798_p4 }
  0x1d   : > { %p1801_p8 = pnand %p1800_p7, %p1796_p3 }
  0x1f   : > { %1804 = shalt.err (!%p1801_p8)
}
  0x20   : > { %s1805_s15 = scalar_lea.vmem %s2007_s10, 2048  ;;  %s1888_s19 = smov [#allocation3]  }
  0x21   : > { %p1806_p10 = scmp.ne.s32.totalorder %s2007_s10, %s1805_s15  ;;  %s1810_s24 = sshll.u32 %s1888_s19, 4  ;;  %s1811_s24 = int_to_ptr.vmem [resolvable:$false] %s1810_s24 }
  0x22   : > { %s1812_s20 = scalar_lea.vmem %s1811_s24, 4096  ;;  %p1813_p2 = scmp.lt.s32.totalorder %s2007_s10, %s1811_s24 }
  0x23   : > { %p1808_p9 = pnand %p1806_p10, %p1794_p1  ;;  %p1814_p12 = scmp.lt.s32.totalorder %s1812_s20, %s1805_s15 }
  0x25   : > { %p1809_p0 = pneg %p1808_p9  ;;  %p1815_p11 = por %p1814_p12, %p1813_p2 }
  0x27   : > { %p1816_p6 = pnand %p1815_p11, %p1809_p0 }
  0x29   : > { %1819 = shalt.err (!%p1816_p6)
}
  0x2a   : > { %s1889_s14 = smov 256   ;;  %s1890_s22 = smov 128  }
  0x2b   : > { %s1891_s21 = smov 8   ;;  %p1549_p9 = scmp.ge.s32.totalorder %s1886_s30, 1 }
  0x2c   : > { %1744 = dma.hbm_to_vmem [thread:$0]  (!%p2011_p13), %s2005_s25, 2048, %s2007_s10, %s2015_s13, %s1889_s14, %s1890_s22, %s1891_s21  }
  0x2d   : > { %p283_p1 = scmp.lt.s32.totalorder %s1886_s30, 3 }
  0x2f   : > { %p284_p3 = pnand %p1549_p9, %p283_p1 }
  0x31   : > { %287 = sbr.rel (%p284_p3) target bundleno = 605 (0x25d), region = 52 }
  0x36   : > { %s2038_s23 = sand.u32 1, %s1878_s28   ;;  %p2853_p6 = scmp.ne.s32.totalorder %s2849_s16, 0 }
  0x37   : > { %s1550_s26 = sshll.u32 %s2038_s23, 7  ;;  %s290_s15 = scalar_lea.sflag [#allocation4], %s2038_s23 }
  0x38   : > { %s2044_s19 = scalar_lea.vmem [#allocation3], %s1550_s26 }
  0x39   : > { %1865 = dma.done.wait (%p2853_p6), %s290_s15, 2048  }
  0x3a   : > { %1867 = vsyncadd (%p2853_p6), %s290_s15, 4294965248  ;;  %v1892_v0 = vmov 0   ;;  %v359_v1 = vld [vmem:[%s2835_s1 + $0x78] sm:$0xff]  ;;  %v358_v2 = vld [vmem:[%s2835_s1 + $0x70] sm:$0xff]  ;;  %s2749_s12 = scalar_lea.vmem [#allocation6], %s1550_s26  ;;  %s1560_s26 = sshll.u32 %s1963_s9, 12 }
  0x3b   : > { %1790 = vset.pattern.permute.xlu0 %v1892_v0  ;;  %1791 = vset.pattern.permute.xlu1 %v1892_v0  ;;  %v357_v3 = vld [vmem:[%s2835_s1 + $0x68] sm:$0xff]  ;;  %v356_v4 = vld [vmem:[%s2835_s1 + $0x60] sm:$0xff]  ;;  %v355_v6 = vld [vmem:[%s2835_s1 + $0x58] sm:$0xff]  ;;  %s2780_s24 = scalar_lea.hbm %s2842_s8, %s1560_s26  ;;  %s1466_s20 = sshll.u32 %s2749_s12, 4  ;;  %s2789_s20 = int_to_ptr.vmem [resolvable:$true] %s1466_s20 }
  0x3c   : > { %1625 = vmatprep.subr.mxu0 %v359_v1  ;;  %v328_v5 = vld [vmem:[%s2044_s19] sm:$0xff]  ;;  %v354_v7 = vld [vmem:[%s2835_s1 + $0x50] sm:$0xff]  ;;  %v353_v10 = vld [vmem:[%s2835_s1 + $0x48] sm:$0xff]  ;;  %s2787_s9 = scalar_lea.hbm %s2780_s24, 128  ;;  %s1451_s16 = scalar_lea.sflag [#allocation5], %s2038_s23 }
  0x3d   : > { %1626 = vmatpush3.msra.mxu0 %v359_v1  ;;  %1657 = vmatprep.mubr.f32.mxu0 %v328_v5  ;;  %v961_v8 = vld [vmem:[%s2840_s6] sm:$0xff]  ;;  %v962_v11 = vld [vmem:[%s2840_s6 + $0x8] sm:$0xff]  ;;  %v351_v14 = vld [vmem:[%s2835_s1 + $0x38] sm:$0xff]  ;;  %s1821_s14 = scalar_lea.vmem %s2789_s20, 2048  ;;  %p2857_p12 = scmp.ne.s32.totalorder %s2850_s17, 0 }
  0x3e   : > { %1627 = vmatprep.subr.mxu0 %v358_v2  ;;  %v1122_v9 = vld [vmem:[%s2841_s7] sm:$0xff]  ;;  %979 = vperm.xlu0 %1790, %v961_v8   ;;  %v1123_v13 = vld [vmem:[%s2841_s7 + $0x8] sm:$0xff]  ;;  %v963_v15 = vld [vmem:[%s2840_s6 + $0x10] sm:$0xff]  ;;  %p1822_p11 = scmp.ne.s32.totalorder %s2789_s20, %s1821_s14  ;;  %s1893_s22 = smov [#allocation6]  }
  0x3f   : > { %1628 = vmatpush3.msra.mxu0 %v358_v2  ;;  %1140 = vperm.xlu1 %1791, %v1122_v9   ;;  %v352_v12 = vld [vmem:[%s2835_s1 + $0x40] sm:$0xff]  ;;  %v350_v16 = vld [vmem:[%s2835_s1 + $0x30] sm:$0xff]  ;;  %v964_v17 = vld [vmem:[%s2840_s6 + $0x18] sm:$0xff]  ;;  %s1825_s21 = sshll.u32 %s1893_s22, 4  ;;  %s1826_s21 = int_to_ptr.vmem [resolvable:$false] %s1825_s21 }
  0x40   : > { %1629 = vmatprep.subr.mxu0 %v357_v3  ;;  %v349_v18 = vld [vmem:[%s2835_s1 + $0x28] sm:$0xff]  ;;  %v1124_v19 = vld [vmem:[%s2841_s7 + $0x10] sm:$0xff]  ;;  %v348_v20 = vld [vmem:[%s2835_s1 + $0x20] sm:$0xff]  ;;  %p1823_p13 = pnand %p1822_p11, %p2857_p12  ;;  %s1827_s15 = scalar_lea.vmem %s1826_s21, 4096 }
  0x41   : > { %1630 = vmatpush3.msra.mxu0 %v357_v3  ;;  %v1125_v21 = vld [vmem:[%s2841_s7 + $0x18] sm:$0xff]  ;;  %v965_v23 = vld [vmem:[%s2840_s6 + $0x20] sm:$0xff]  ;;  %v346_v24 = vld [vmem:[%s2835_s1 + $0x10] sm:$0xff]  ;;  %p1828_p5 = scmp.lt.s32.totalorder %s2789_s20, %s1826_s21  ;;  %p1829_p7 = scmp.lt.s32.totalorder %s1827_s15, %s1821_s14 }
  0x42   : > { %1631 = vmatprep.subr.mxu0 %v356_v4  ;;  %984 = vperm.xlu0 %1790, %v962_v11   ;;  %v347_v22 = vld [vmem:[%s2835_s1 + $0x18] sm:$0xff]  ;;  %v966_v25 = vld [vmem:[%s2840_s6 + $0x28] sm:$0xff]  ;;  %v1126_v27 = vld [vmem:[%s2841_s7 + $0x20] sm:$0xff]  ;;  %p1824_p4 = pneg %p1823_p13 }
  0x43   : > { %1632 = vmatpush3.msra.mxu0 %v356_v4  ;;  %1145 = vperm.xlu1 %1791, %v1123_v13   ;;  %v345_v26 = vld [vmem:[%s2835_s1 + $0x8] sm:$0xff]  ;;  %v344_v28 = vld [vmem:[%s2835_s1] sm:$0xff]  ;;  %v330_v31 = vld [vmem:[%s2044_s19 + $0x10] sm:$0xff]  ;;  %p1830_p8 = por %p1829_p7, %p1828_p5 }
  0x44   : > { %1633 = vmatprep.subr.mxu0 %v355_v6  ;;  %v1127_v29 = vld [vmem:[%s2841_s7 + $0x28] sm:$0xff]  ;;  %v967_v32 = vld [vmem:[%s2840_s6 + $0x30] sm:$0xff]  ;;  %v968_v33 = vld [vmem:[%s2840_s6 + $0x38] sm:$0xff] }
  0x45   : > { %1634 = vmatpush3.msra.mxu0 %v355_v6  ;;  %v329_v30 = vld [vmem:[%s2044_s19 + $0x8] sm:$0xff]  ;;  %v331_v34 = vld [vmem:[%s2044_s19 + $0x18] sm:$0xff]  ;;  %v332_v35 = vld [vmem:[%s2044_s19 + $0x20] sm:$0xff]  ;;  %p1831_p10 = pnand %p1830_p8, %p1824_p4 }
  0x46   : > { %1635 = vmatprep.subr.mxu0 %v354_v7  ;;  %989 = vperm.xlu0 %1790, %v963_v15   ;;  %v1128_v36 = vld [vmem:[%s2841_s7 + $0x30] sm:$0xff]  ;;  %v1129_v37 = vld [vmem:[%s2841_s7 + $0x38] sm:$0xff]  ;;  %v333_v38 = vld [vmem:[%s2044_s19 + $0x28] sm:$0xff] }
  0x47   : > { %1636 = vmatpush3.msra.mxu0 %v354_v7  ;;  %994 = vperm.xlu1 %1791, %v964_v17   ;;  %v334_v39 = vld [vmem:[%s2044_s19 + $0x30] sm:$0xff]  ;;  %v969_v40 = vld [vmem:[%s2840_s6 + $0x40] sm:$0xff]  ;;  %v970_v41 = vld [vmem:[%s2840_s6 + $0x48] sm:$0xff]  ;;  %v569_v17 = vlaneseq }
  0x48   : > { %1637 = vmatprep.subr.mxu0 %v353_v10  ;;  %v335_v42 = vld [vmem:[%s2044_s19 + $0x38] sm:$0xff]  ;;  %v336_v43 = vld [vmem:[%s2044_s19 + $0x40] sm:$0xff]  ;;  %v1131_v45 = vld [vmem:[%s2841_s7 + $0x48] sm:$0xff] }
  0x49   : > { %1638 = vmatpush3.msra.mxu0 %v353_v10  ;;  %v1130_v44 = vld [vmem:[%s2841_s7 + $0x40] sm:$0xff]  ;;  %v337_v46 = vld [vmem:[%s2044_s19 + $0x48] sm:$0xff]  ;;  %v338_v47 = vld [vmem:[%s2044_s19 + $0x50] sm:$0xff] }
  0x4a   : > { %1639 = vmatprep.subr.mxu0 %v352_v12  ;;  %1150 = vperm.xlu0 %1790, %v1124_v19   ;;  %v971_v48 = vld [vmem:[%s2840_s6 + $0x50] sm:$0xff]  ;;  %v972_v49 = vld [vmem:[%s2840_s6 + $0x58] sm:$0xff]  ;;  %v340_v51 = vld [vmem:[%s2044_s19 + $0x60] sm:$0xff] }
  0x4b   : > { %1640 = vmatpush3.msra.mxu0 %v352_v12  ;;  %1155 = vperm.xlu1 %1791, %v1125_v21   ;;  %v339_v50 = vld [vmem:[%s2044_s19 + $0x58] sm:$0xff]  ;;  %v1132_v52 = vld [vmem:[%s2841_s7 + $0x50] sm:$0xff]  ;;  %v341_v54 = vld [vmem:[%s2044_s19 + $0x68] sm:$0xff] }
  0x4c   : > { %1641 = vmatprep.subr.mxu0 %v351_v14  ;;  %v1133_v53 = vld [vmem:[%s2841_s7 + $0x58] sm:$0xff]  ;;  %v342_v55 = vld [vmem:[%s2044_s19 + $0x70] sm:$0xff]  ;;  %v973_v56 = vld [vmem:[%s2840_s6 + $0x60] sm:$0xff] }
  0x4d   : > { %1642 = vmatpush3.msra.mxu0 %v351_v14  ;;  %v974_v57 = vld [vmem:[%s2840_s6 + $0x68] sm:$0xff]  ;;  %v343_v58 = vld [vmem:[%s2044_s19 + $0x78] sm:$0xff]  ;;  %v1134_v59 = vld [vmem:[%s2841_s7 + $0x60] sm:$0xff] }
  0x4e   : > { %1643 = vmatprep.subr.mxu0 %v350_v16  ;;  %999 = vperm.xlu0 %1790, %v965_v23   ;;  %v1135_v60 = vld [vmem:[%s2841_s7 + $0x68] sm:$0xff]  ;;  %v975_v61 = vld [vmem:[%s2840_s6 + $0x70] sm:$0xff]  ;;  %v976_v62 = vld [vmem:[%s2840_s6 + $0x78] sm:$0xff] }
  0x4f   : > { %1644 = vmatpush3.msra.mxu0 %v350_v16  ;;  %1004 = vperm.xlu1 %1791, %v966_v25   ;;  %v1136_v63 = vld [vmem:[%s2841_s7 + $0x70] sm:$0xff]  ;;  %v1137_v0 = vld [vmem:[%s2841_s7 + $0x78] sm:$0xff]  ;;  %v1263_v3 = vld [vmem:[%s2838_s4 + $0x68] sm:$0xff] }
  0x50   : > { %1645 = vmatprep.subr.mxu0 %v349_v18  ;;  %v1265_v1 = vld [vmem:[%s2838_s4 + $0x78] sm:$0xff]  ;;  %v1264_v2 = vld [vmem:[%s2838_s4 + $0x70] sm:$0xff]  ;;  %v1262_v4 = vld [vmem:[%s2838_s4 + $0x60] sm:$0xff] }
  0x51   : > { %1646 = vmatpush3.msra.mxu0 %v349_v18  ;;  %1681 = vmatprep.subr.mxu1 %v1265_v1  ;;  %v1261_v5 = vld [vmem:[%s2838_s4 + $0x58] sm:$0xff]  ;;  %v1260_v6 = vld [vmem:[%s2838_s4 + $0x50] sm:$0xff]  ;;  %v1259_v7 = vld [vmem:[%s2838_s4 + $0x48] sm:$0xff]  ;;  %v2258_v18 = vshrl.u32 %v569_v17, 7 }
  0x52   : > { %1647 = vmatprep.subr.mxu0 %v348_v20  ;;  %1160 = vperm.xlu0 %1790, %v1126_v27   ;;  %v1258_v8 = vld [vmem:[%s2838_s4 + $0x40] sm:$0xff]  ;;  %v1257_v9 = vld [vmem:[%s2838_s4 + $0x38] sm:$0xff]  ;;  %v1256_v10 = vld [vmem:[%s2838_s4 + $0x30] sm:$0xff] }
  0x53   : > { %1648 = vmatpush3.msra.mxu0 %v348_v20  ;;  %1165 = vperm.xlu1 %1791, %v1127_v29   ;;  %v1255_v11 = vld [vmem:[%s2838_s4 + $0x28] sm:$0xff]  ;;  %v1254_v12 = vld [vmem:[%s2838_s4 + $0x20] sm:$0xff]  ;;  %v1253_v13 = vld [vmem:[%s2838_s4 + $0x18] sm:$0xff]  ;;  %v571_v19 = vsub.s32 0, %v2258_v18  ;;  %v607_v20 = vsub.s32 1, %v2258_v18  ;;  %vm1105_vm0 = vcmp.lt.s32.totalorder %v2258_v18, 7 }
  0x54   : > { %1649 = vmatprep.subr.mxu0 %v347_v22  ;;  %1682 = vmatpush3.msra.mxu1 %v1265_v1  ;;  %v1252_v14 = vld [vmem:[%s2838_s4 + $0x10] sm:$0xff]  ;;  %v1251_v15 = vld [vmem:[%s2838_s4 + $0x8] sm:$0xff]  ;;  %v1250_v16 = vld [vmem:[%s2838_s4] sm:$0xff]  ;;  %vm944_vm1 = vcmp.lt.s32.totalorder %v2258_v18, 1 }
  0x55   : > { %1650 = vmatpush3.msra.mxu0 %v347_v22  ;;  %1683 = vmatprep.subr.mxu1 %v1264_v2  ;;  %v550_v21 = vld [vmem:[%s2837_s3] sm:$0x7]  ;;  %v643_v22 = vsub.s32 2, %v2258_v18  ;;  %v552_v25 = vld [vmem:[%s2837_s3 + $0x8] sm:$0x7] }
  0x56   : > { %1651 = vmatprep.subr.mxu0 %v346_v24  ;;  %1009 = vperm.xlu0 %1790, %v967_v32   ;;  %v2269_v23 = vld [vmem:[%s2836_s2] ss:$0 sm:$0xff]  ;;  %v2277_v27 = vrot.slane %v550_v21, %v571_v19  ;;  %v2286_v32 = vrot.slane %v552_v25, %v571_v19 }
  0x57   : > { %1652 = vmatpush3.msra.mxu0 %v346_v24  ;;  %1014 = vperm.xlu1 %1791, %v968_v33   ;;  %v551_v24 = vld [vmem:[%s2837_s3 + $0x4] sm:$0x7] }
  0x58   : > { %1653 = vmatprep.subr.mxu0 %v345_v26  ;;  %1684 = vmatpush3.msra.mxu1 %v1264_v2 }
  0x59   : > { %1654 = vmatpush3.msra.mxu0 %v345_v26  ;;  %1685 = vmatprep.subr.mxu1 %v1263_v3 }
  0x5a   : > { %1655 = vmatprep.subr.mxu0 %v344_v28  ;;  %1170 = vperm.xlu0 %1790, %v1128_v36   ;;  %v2292_v36 = vrot.slane %v552_v25, %v607_v20 }
  0x5b   : > { %1656 = vmatpush3.msra.mxu0 %v344_v28  ;;  %1175 = vperm.xlu1 %1791, %v1129_v37   ;;  %v2279_v28 = vrot.slane %v550_v21, %v607_v20  ;;  %v2294_v37 = vrot.slane %v552_v25, %v643_v22 }
  0x5c   : > { %1658 = vmatmul.mubr.f32.vlgmr.msra.gmra.mxu0 %v329_v30  ;;  %1686 = vmatpush3.msra.mxu1 %v1263_v3  ;;  %v2282_v30 = vrot.slane %v550_v21, %v643_v22 }
  0x5d   : > { %1660 = vmatprep.mubr.f32.mxu0 %v330_v31  ;;  %1687 = vmatprep.subr.mxu1 %v1262_v4  ;;  %v2284_v31 = vrot.slane %v551_v24, %v643_v22 }
  0x5e   : > { %1019 = vperm.xlu0 %1790, %v969_v40   ;;  %1688 = vmatpush3.msra.mxu1 %v1262_v4  ;;  %v2300_v40 = vmul.f32 0.0, %v2277_v27 }
  0x5f   : > { %1024 = vperm.xlu1 %1791, %v970_v41   ;;  %1689 = vmatprep.subr.mxu1 %v1261_v5  ;;  %v2303_v41 = vmul.f32 0.0, %v2279_v28 }
  0x60   : > { %1661 = vmatmul.mubr.f32.gmra.mxu0 %v331_v34  ;;  %1690 = vmatpush3.msra.mxu1 %v1261_v5  ;;  %v2288_v34 = vrot.slane %v551_v24, %v571_v19 }
  0x61   : > { %1663 = vmatprep.mubr.f32.mxu0 %v332_v35  ;;  %1691 = vmatprep.subr.mxu1 %v1260_v6  ;;  %v2290_v35 = vrot.slane %v551_v24, %v607_v20 }
  0x62   : > { %1180 = vperm.xlu0 %1790, %v1130_v44   ;;  %1692 = vmatpush3.msra.mxu1 %v1260_v6  ;;  %v2309_v44 = vmul.f32 0.0, %v2286_v32 }
  0x63   : > { %1185 = vperm.xlu1 %1791, %v1131_v45   ;;  %1693 = vmatprep.subr.mxu1 %v1259_v7  ;;  %v2312_v45 = vmul.f32 0.0, %v2294_v37 }
  0x64   : > { %1664 = vmatmul.mubr.f32.gmra.mxu0 %v333_v38  ;;  %1694 = vmatpush3.msra.mxu1 %v1259_v7 }
  0x65   : > { %1666 = vmatprep.mubr.f32.mxu0 %v334_v39  ;;  %1695 = vmatprep.subr.mxu1 %v1258_v8 }
  0x66   : > { %1029 = vperm.xlu0 %1790, %v971_v48   ;;  %1696 = vmatpush3.msra.mxu1 %v1258_v8 }
  0x67   : > { %1034 = vperm.xlu1 %1791, %v972_v49   ;;  %1697 = vmatprep.subr.mxu1 %v1257_v9 }
  0x68   : > { %1667 = vmatmul.mubr.f32.gmra.mxu0 %v335_v42  ;;  %1698 = vmatpush3.msra.mxu1 %v1257_v9 }
  0x69   : > { %1669 = vmatprep.mubr.f32.mxu0 %v336_v43  ;;  %1699 = vmatprep.subr.mxu1 %v1256_v10  ;;  %v2306_v43 = vmul.f32 0.0, %v2282_v30 }
  0x6a   : > { %1190 = vperm.xlu0 %1790, %v1132_v52   ;;  %1700 = vmatpush3.msra.mxu1 %v1256_v10 }
  0x6b   : > { %1195 = vperm.xlu1 %1791, %v1133_v53   ;;  %1701 = vmatprep.subr.mxu1 %v1255_v11 }
  0x6c   : > { %1670 = vmatmul.mubr.f32.gmra.mxu0 %v337_v46  ;;  %1702 = vmatpush3.msra.mxu1 %v1255_v11  ;;  %v2315_v46 = vmul.f32 0.0, %v2292_v36 }
  0x6d   : > { %1672 = vmatprep.mubr.f32.mxu0 %v338_v47  ;;  %1703 = vmatprep.subr.mxu1 %v1254_v12 }
  0x6e   : > { %1039 = vperm.xlu0 %1790, %v973_v56   ;;  %1704 = vmatpush3.msra.mxu1 %v1254_v12 }
  0x6f   : > { %1044 = vperm.xlu1 %1791, %v974_v57   ;;  %1705 = vmatprep.subr.mxu1 %v1253_v13 }
  0x70   : > { %1673 = vmatmul.mubr.f32.gmra.mxu0 %v339_v50  ;;  %1706 = vmatpush3.msra.mxu1 %v1253_v13 }
  0x71   : > { %1675 = vmatprep.mubr.f32.mxu0 %v340_v51  ;;  %1707 = vmatprep.subr.mxu1 %v1252_v14 }
  0x72   : > { %1200 = vperm.xlu0 %1790, %v1134_v59   ;;  %1708 = vmatpush3.msra.mxu1 %v1252_v14 }
  0x73   : > { %1205 = vperm.xlu1 %1791, %v1135_v60   ;;  %1709 = vmatprep.subr.mxu1 %v1251_v15 }
  0x74   : > { %1676 = vmatmul.mubr.f32.gmra.mxu0 %v341_v54  ;;  %1710 = vmatpush3.msra.mxu1 %v1251_v15 }
  0x75   : > { %1678 = vmatprep.mubr.f32.mxu0 %v342_v55  ;;  %1711 = vmatprep.subr.mxu1 %v1250_v16 }
  0x76   : > { %1049 = vperm.xlu0 %1790, %v975_v61   ;;  %1712 = vmatpush3.msra.mxu1 %v1250_v16 }
  0x77   : > { %1054 = vperm.xlu1 %1791, %v976_v62  }
  0x78   : > { %1679 = vmatmul.mubr.f32.gmra.mxu0 %v343_v58 }
  0x7a   : > { %1210 = vperm.xlu0 %1790, %v1136_v63  }
  0x7b   : > { %1215 = vperm.xlu1 %1791, %v1137_v0  }
  0xb9   : > { %v2349_v10 = vpop.permute.xlu0 %979 }
  0xba   : > { %v1141_v15 = vpop.permute.xlu1 %1140 }
 0x11c   : > { %v1659_v26 = vpop.f32.mrf.mxu0 }
 0x11d   : > { %v439_v29 = vadd.f32 %v1659_v26, %v2269_v23 }
 0x11e   : > { %v433_v33 = vpop.f32.mrf.mxu0 }
 0x11f   : > { %v2296_v38 = vmax.f32 %v439_v29, 0.0  ;;  %v434_v39 = vadd.f32 %v2269_v23, %v433_v33 }
 0x120   : > { %v1662_v42 = vpop.f32.mrf.mxu0 }
 0x121   : > { %v512_v47 = vmax.f32 %v434_v39, 0.0  ;;  %v449_v48 = vadd.f32 %v1662_v42, %v2269_v23  ;;  %v770_v49 = vmul.f32 %v2284_v31, %v2296_v38  ;;  %v822_v50 = vmul.f32 %v2286_v32, %v2296_v38 }
 0x122   : > { %v443_v51 = vpop.f32.mrf.mxu0  ;;  %v858_v52 = vmul.f32 %v2292_v36, %v2296_v38  ;;  %v894_v53 = vmul.f32 %v2294_v37, %v2296_v38  ;;  %v647_v54 = vmul.f32 %v2282_v30, %v2296_v38  ;;  %v698_v55 = vmul.f32 %v2288_v34, %v2296_v38 }
 0x123   : > { %v2331_v56 = vmax.f32 %v449_v48, 0.0  ;;  %v444_v57 = vadd.f32 %v2269_v23, %v443_v51  ;;  %v646_v58 = vmul.f32 %v2282_v30, %v512_v47  ;;  %v697_v59 = vmul.f32 %v2288_v34, %v512_v47 }
 0x124   : > { %v1665_v60 = vpop.f32.mrf.mxu0  ;;  %v733_v61 = vmul.f32 %v2290_v35, %v512_v47  ;;  %v769_v62 = vmul.f32 %v2284_v31, %v512_v47  ;;  %v574_v63 = vmul.f32 %v2277_v27, %v512_v47  ;;  %v610_v0 = vmul.f32 %v2279_v28, %v512_v47 }
 0x125   : > { %v2340_v1 = vmax.f32 %v444_v57, 0.0  ;;  %v459_v2 = vadd.f32 %v1665_v60, %v2269_v23  ;;  %v713_v3 = vadd.f32 %v697_v59, %v2300_v40  ;;  %v786_v4 = vadd.f32 %v770_v49, %v646_v58  ;;  %v985_v58 = vpop.permute.xlu0 %984 }
 0x126   : > { %v453_v5 = vpop.f32.mrf.mxu0  ;;  %v749_v6 = vadd.f32 %v733_v61, %v2303_v41  ;;  %v785_v7 = vadd.f32 %v769_v62, %v2306_v43  ;;  %v714_v8 = vadd.f32 %v698_v55, %v574_v63  ;;  %v734_v9 = vmul.f32 %v2290_v35, %v2296_v38  ;;  %v1146_v63 = vpop.permute.xlu1 %1145 }
 0x127   : > { %v2351_v11 = vmax.f32 %v459_v2, 0.0  ;;  %v454_v12 = vadd.f32 %v2269_v23, %v453_v5  ;;  %v2354_v13 = vadd.f32 %v822_v50, %v713_v3  ;;  %v895_v14 = vmul.f32 %v2294_v37, %v2340_v1 }
 0x128   : > { %v1668_v16 = vpop.f32.mrf.mxu0  ;;  %v2358_v17 = vadd.f32 %v858_v52, %v749_v6  ;;  %v2360_v19 = vadd.f32 %v894_v53, %v785_v7  ;;  %v750_v20 = vadd.f32 %v734_v9, %v610_v0  ;;  %v771_v21 = vmul.f32 %v2284_v31, %v2340_v1 }
 0x129   : > { %v2364_v22 = vmax.f32 %v454_v12, 0.0  ;;  %v469_v24 = vadd.f32 %v1668_v16, %v2269_v23  ;;  %v911_v25 = vadd.f32 %v895_v14, %v786_v4  ;;  %v926_v26 = vrot.slane %v2354_v13, 7 }
 0x12a   : > { %2854 = vst [vmem:[#allocation10_spill] sm:$0xff] %v2360_v19  ;;  %v463_v29 = vpop.f32.mrf.mxu0  ;;  %v2845_v33 = vrot.slane %v2360_v19, 1  ;;  %v787_v39 = vadd.f32 %v771_v21, %v647_v54  ;;  %v823_v42 = vmul.f32 %v2286_v32, %v2340_v1  ;;  %v859_v47 = vmul.f32 %v2292_v36, %v2340_v1 }
 0x12b   : > { %v2373_v48 = vmax.f32 %v469_v24, 0.0  ;;  %v464_v49 = vadd.f32 %v2269_v23, %v463_v29  ;;  %v1090_v50 = vrot.slane %v911_v25, 1  ;;  %v896_v51 = vmul.f32 %v2294_v37, %v2331_v56 }
 0x12c   : > { %v1671_v52 = vpop.f32.mrf.mxu0  ;;  %v839_v53 = vadd.f32 %v823_v42, %v714_v8  ;;  %v875_v55 = vadd.f32 %v859_v47, %v750_v20  ;;  %v575_v54 = vmul.f32 %v2277_v27, %v2296_v38  ;;  %v611_v57 = vmul.f32 %v2279_v28, %v2296_v38 }
 0x12d   : > { %v2382_v59 = vmax.f32 %v464_v49, 0.0  ;;  %v479_v60 = vadd.f32 %v1671_v52, %v2269_v23  ;;  %v1120_v61 = vsel %vm1105_vm0, %v2845_v33, %v1090_v50  ;;  %v2389_v62 = vadd.f32 %v896_v51, %v787_v39  ;;  %v990_v51 = vpop.permute.xlu0 %989 }
 0x12e   : > { %v473_v0 = vpop.f32.mrf.mxu0  ;;  %v2391_v2 = vmul.f32 %v1141_v15, %v1120_v61  ;;  %v927_v3 = vrot.slane %v839_v53, 7  ;;  %v648_v38 = vmul.f32 %v2282_v30, %v2340_v1  ;;  %v699_v4 = vmul.f32 %v2288_v34, %v2340_v1  ;;  %v995_v61 = vpop.permute.xlu1 %994 }
 0x12f   : > { %v2397_v5 = vmax.f32 %v479_v60, 0.0  ;;  %v474_v6 = vadd.f32 %v2269_v23, %v473_v0  ;;  %v1091_v7 = vrot.slane %v2389_v62, 1  ;;  %v735_v8 = vmul.f32 %v2290_v35, %v2340_v1 }
 0x130   : > { %v1674_v9 = vpop.f32.mrf.mxu0  ;;  %v959_v12 = vsel %vm944_vm1, %v926_v26, %v927_v3  ;;  %v715_v14 = vadd.f32 %v699_v4, %v575_v54  ;;  %v772_v15 = vmul.f32 %v2284_v31, %v2331_v56  ;;  %v824_v16 = vmul.f32 %v2286_v32, %v2331_v56 }
 0x131   : > { %v2411_v20 = vmax.f32 %v474_v6, 0.0  ;;  %v489_v21 = vadd.f32 %v1674_v9, %v2269_v23  ;;  %v1058_v24 = vmul.f32 %v985_v58, %v959_v12  ;;  %v1119_v25 = vsel %vm1105_vm0, %v1090_v50, %v1091_v7 }
 0x132   : > { %v483_v29 = vpop.f32.mrf.mxu0  ;;  %v1219_v39 = vmul.f32 %v1146_v63, %v1119_v25  ;;  %v751_v42 = vadd.f32 %v735_v8, %v611_v57  ;;  %v788_v47 = vadd.f32 %v772_v15, %v648_v38  ;;  %v840_v49 = vadd.f32 %v824_v16, %v715_v14 }
 0x133   : > { %v2416_v52 = vmax.f32 %v489_v21, 0.0  ;;  %v484_v53 = vadd.f32 %v2269_v23, %v483_v29  ;;  %v1074_v54 = vadd.f32 %v1058_v24, %v875_v55  ;;  %v860_v60 = vmul.f32 %v2292_v36, %v2331_v56 }
 0x134   : > { %v1677_v62 = vpop.f32.mrf.mxu0  ;;  %v897_v58 = vmul.f32 %v2294_v37, %v2364_v22  ;;  %v928_v50 = vrot.slane %v840_v49, 7  ;;  %v576_v57 = vmul.f32 %v2277_v27, %v2340_v1  ;;  %v612_v63 = vmul.f32 %v2279_v28, %v2340_v1 }
 0x135   : > { %v2427_v0 = vmax.f32 %v484_v53, 0.0  ;;  %v499_v38 = vadd.f32 %v1677_v62, %v2269_v23  ;;  %v2430_v55 = vadd.f32 %v1219_v39, %v1074_v54  ;;  %v876_v4 = vadd.f32 %v860_v60, %v751_v42  ;;  %v1151_v42 = vpop.permute.xlu0 %1150 }
 0x136   : > { %v493_v6 = vpop.f32.mrf.mxu0  ;;  %v913_v8 = vadd.f32 %v897_v58, %v788_v47  ;;  %v958_v9 = vsel %vm944_vm1, %v927_v3, %v928_v50  ;;  %v649_v12 = vmul.f32 %v2282_v30, %v2331_v56  ;;  %v700_v14 = vmul.f32 %v2288_v34, %v2331_v56 }
 0x137   : > { %v2438_v15 = vmax.f32 %v499_v38, 0.0  ;;  %v494_v1 = vadd.f32 %v2269_v23, %v493_v6  ;;  %v1059_v16 = vmul.f32 %v990_v51, %v958_v9  ;;  %v736_v21 = vmul.f32 %v2290_v35, %v2331_v56  ;;  %v1156_v51 = vpop.permute.xlu1 %1155 }
 0x138   : > { %v1680_v24 = vpop.f32.mrf.mxu0  ;;  %v1092_v25 = vrot.slane %v913_v8, 1  ;;  %v716_v29 = vadd.f32 %v700_v14, %v576_v57  ;;  %v773_v3 = vmul.f32 %v2284_v31, %v2364_v22  ;;  %v825_v39 = vmul.f32 %v2286_v32, %v2364_v22 }
 0x139   : > { %v2447_v47 = vmax.f32 %v494_v1, 0.0  ;;  %v509_v49 = vadd.f32 %v1680_v24, %v2269_v23  ;;  %v1075_v53 = vadd.f32 %v1059_v16, %v876_v4  ;;  %v752_v54 = vadd.f32 %v736_v21, %v612_v63 }
 0x13a   : > { %v503_v60 = vpop.f32.mrf.mxu0  ;;  %v1118_v62 = vsel %vm1105_vm0, %v1091_v7, %v1092_v25  ;;  %v789_v58 = vadd.f32 %v773_v3, %v649_v12  ;;  %v841_v57 = vadd.f32 %v825_v39, %v716_v29  ;;  %v861_v38 = vmul.f32 %v2292_v36, %v2364_v22  ;;  %v1000_v39 = vpop.permute.xlu0 %999 }
 0x13b   : > { %v2454_v6 = vmax.f32 %v509_v49, 0.0  ;;  %v504_v8 = vadd.f32 %v2269_v23, %v503_v60  ;;  %v1220_v9 = vmul.f32 %v1151_v42, %v1118_v62  ;;  %v898_v14 = vmul.f32 %v2294_v37, %v2351_v11  ;;  %v1005_v60 = vpop.permute.xlu1 %1004 }
 0x13c   : > { %v877_v4 = vadd.f32 %v861_v38, %v752_v54  ;;  %v929_v63 = vrot.slane %v841_v57, 7  ;;  %v577_v1 = vmul.f32 %v2277_v27, %v2331_v56  ;;  %v613_v7 = vmul.f32 %v2279_v28, %v2331_v56 }
 0x13d   : > { %v2463_v12 = vmax.f32 %v504_v8, 0.0  ;;  %v712_v16 = vmul.f32 %v2288_v34, %v2454_v6  ;;  %v2467_v21 = vadd.f32 %v1220_v9, %v1075_v53  ;;  %v914_v23 = vadd.f32 %v898_v14, %v789_v58 }
 0x13e   : > { %v957_v24 = vsel %vm944_vm1, %v928_v50, %v929_v63  ;;  %v650_v29 = vmul.f32 %v2282_v30, %v2364_v22  ;;  %v701_v3 = vmul.f32 %v2288_v34, %v2364_v22  ;;  %v737_v56 = vmul.f32 %v2290_v35, %v2364_v22 }
 0x13f   : > { %v588_v42 = vmul.f32 %v2277_v27, %v2463_v12  ;;  %v1060_v49 = vmul.f32 %v995_v61, %v957_v24  ;;  %v1093_v53 = vrot.slane %v914_v23, 1  ;;  %v774_v54 = vmul.f32 %v2284_v31, %v2351_v11 }
 0x140   : > { %v717_v50 = vadd.f32 %v701_v3, %v577_v1  ;;  %v753_v62 = vadd.f32 %v737_v56, %v613_v7  ;;  %v826_v58 = vmul.f32 %v2286_v32, %v2351_v11  ;;  %v862_v57 = vmul.f32 %v2292_v36, %v2351_v11  ;;  %v1161_v56 = vpop.permute.xlu0 %1160 }
 0x141   : > { %v728_v38 = vadd.f32 %v712_v16, %v588_v42  ;;  %v1076_v8 = vadd.f32 %v1060_v49, %v877_v4  ;;  %v1117_v9 = vsel %vm1105_vm0, %v1092_v25, %v1093_v53  ;;  %v790_v14 = vadd.f32 %v774_v54, %v650_v29 }
 0x142   : > { %v1221_v61 = vmul.f32 %v1156_v51, %v1117_v9  ;;  %v842_v23 = vadd.f32 %v826_v58, %v717_v50  ;;  %v878_v24 = vadd.f32 %v862_v57, %v753_v62  ;;  %v899_v33 = vmul.f32 %v2294_v37, %v2382_v59  ;;  %v1166_v50 = vpop.permute.xlu1 %1165 }
 0x143   : > { %v2490_v1 = vadd.f32 %v2309_v44, %v728_v38  ;;  %v578_v7 = vmul.f32 %v2277_v27, %v2364_v22  ;;  %v614_v16 = vmul.f32 %v2279_v28, %v2364_v22  ;;  %v651_v4 = vmul.f32 %v2282_v30, %v2351_v11 }
 0x144   : > { %v2498_v25 = vadd.f32 %v1221_v61, %v1076_v8  ;;  %v915_v51 = vadd.f32 %v899_v33, %v790_v14  ;;  %v930_v29 = vrot.slane %v842_v23, 7  ;;  %v702_v3 = vmul.f32 %v2288_v34, %v2351_v11 }
 0x145   : > { %v941_v42 = vrot.slane %v2490_v1, 7  ;;  %v738_v49 = vmul.f32 %v2290_v35, %v2351_v11  ;;  %v775_v54 = vmul.f32 %v2284_v31, %v2382_v59  ;;  %v827_v22 = vmul.f32 %v2286_v32, %v2382_v59 }
 0x146   : > { %v956_v33 = vsel %vm944_vm1, %v929_v63, %v930_v29  ;;  %v1094_v62 = vrot.slane %v915_v51, 1  ;;  %v718_v58 = vadd.f32 %v702_v3, %v578_v7  ;;  %v863_v57 = vmul.f32 %v2292_v36, %v2382_v59 }
 0x147   : > { %v960_v38 = vsel %vm944_vm1, %v941_v42, %v926_v26  ;;  %v1061_v8 = vmul.f32 %v1000_v39, %v956_v33  ;;  %v754_v9 = vadd.f32 %v738_v49, %v614_v16  ;;  %v791_v14 = vadd.f32 %v775_v54, %v651_v4  ;;  %v1010_v4 = vpop.permute.xlu0 %1009  ;;  %v2535_v54 = vpop.permute.xlu1 %1014 }
 0x148   : > { %v1057_v61 = vmul.f32 %v2349_v10, %v960_v38  ;;  %v1116_v63 = vsel %vm1105_vm0, %v1093_v53, %v1094_v62  ;;  %v843_v23 = vadd.f32 %v827_v22, %v718_v58  ;;  %v900_v7 = vmul.f32 %v2294_v37, %v2373_v48 }
 0x149   : > { %v1077_v51 = vadd.f32 %v1061_v8, %v878_v24  ;;  %v1222_v3 = vmul.f32 %v1161_v56, %v1116_v63  ;;  %v879_v13 = vadd.f32 %v863_v57, %v754_v9  ;;  %v579_v19 = vmul.f32 %v2277_v27, %v2351_v11 }
 0x14a   : > { %v1073_v26 = vadd.f32 %v1057_v61, %v2358_v17  ;;  %v916_v39 = vadd.f32 %v900_v7, %v791_v14  ;;  %v931_v16 = vrot.slane %v843_v23, 7  ;;  %v615_v10 = vmul.f32 %v2279_v28, %v2351_v11 }
 0x14b   : > { %v1238_v49 = vadd.f32 %v1222_v3, %v1077_v51  ;;  %v652_v53 = vmul.f32 %v2282_v30, %v2382_v59  ;;  %v703_v24 = vmul.f32 %v2288_v34, %v2382_v59  ;;  %v739_v56 = vmul.f32 %v2290_v35, %v2382_v59  ;;  %v1171_v3 = vpop.permute.xlu0 %1170 }
 0x14c   : > { %v1234_v17 = vadd.f32 %v2391_v2, %v1073_v26  ;;  %v955_v22 = vsel %vm944_vm1, %v930_v29, %v931_v16  ;;  %v1095_v33 = vrot.slane %v916_v39, 1  ;;  %v776_v11 = vmul.f32 %v2284_v31, %v2373_v48 }
 0x14d   : > { %v1062_v58 = vmul.f32 %v1005_v60, %v955_v22  ;;  %v719_v57 = vadd.f32 %v703_v24, %v579_v19  ;;  %v755_v38 = vadd.f32 %v739_v56, %v615_v10  ;;  %v828_v8 = vmul.f32 %v2286_v32, %v2373_v48 }
 0x14e   : > { %1713 = vmatprep.mubr.f32.mxu1 %v1234_v17  ;;  %v1115_v9 = vsel %vm1105_vm0, %v1094_v62, %v1095_v33  ;;  %v792_v14 = vadd.f32 %v776_v11, %v652_v53  ;;  %v864_v2 = vmul.f32 %v2292_v36, %v2373_v48  ;;  %v580_v29 = vmul.f32 %v2277_v27, %v2382_v59 }
 0x14f   : > { %1714 = vmatmul.mubr.f32.vlgmr.msra.gmra.mxu1 %v2430_v55  ;;  %v1078_v61 = vadd.f32 %v1062_v58, %v879_v13  ;;  %v1223_v60 = vmul.f32 %v1166_v50, %v1115_v9  ;;  %v844_v19 = vadd.f32 %v828_v8, %v719_v57  ;;  %v616_v63 = vmul.f32 %v2279_v28, %v2382_v59  ;;  %v1176_v13 = vpop.permute.xlu1 %1175 }
 0x150   : > { %1716 = vmatprep.mubr.f32.mxu1 %v2467_v21  ;;  %v880_v23 = vadd.f32 %v864_v2, %v755_v38  ;;  %v917_v62 = vadd.f32 %v2312_v45, %v792_v14  ;;  %v704_v7 = vmul.f32 %v2288_v34, %v2373_v48  ;;  %v740_v51 = vmul.f32 %v2290_v35, %v2373_v48 }
 0x151   : > { %v1239_v26 = vadd.f32 %v1223_v60, %v1078_v61  ;;  %v932_v55 = vrot.slane %v844_v19, 7  ;;  %v777_v50 = vmul.f32 %v2284_v31, %v2411_v20  ;;  %v902_v59 = vmul.f32 %v2294_v37, %v2397_v5 }
 0x152   : > { %v1096_v21 = vrot.slane %v917_v62, 1  ;;  %v720_v39 = vadd.f32 %v704_v7, %v580_v29  ;;  %v756_v10 = vadd.f32 %v740_v51, %v616_v63  ;;  %v654_v53 = vmul.f32 %v2282_v30, %v2411_v20 }
 0x153   : > { %1717 = vmatmul.mubr.f32.gmra.mxu1 %v2498_v25  ;;  %v954_v48 = vsel %vm944_vm1, %v931_v16, %v932_v55  ;;  %v793_v24 = vadd.f32 %v777_v50, %v2306_v43  ;;  %v705_v56 = vmul.f32 %v2288_v34, %v2411_v20  ;;  %v741_v17 = vmul.f32 %v2290_v35, %v2411_v20 }
 0x154   : > { %1719 = vmatprep.mubr.f32.mxu1 %v1238_v49  ;;  %v1063_v22 = vmul.f32 %v1010_v4, %v954_v48  ;;  %v1114_v11 = vsel %vm1105_vm0, %v1095_v33, %v1096_v21  ;;  %v845_v58 = vadd.f32 %v2309_v44, %v720_v39  ;;  %v881_v25 = vadd.f32 %v2315_v46, %v756_v10  ;;  %v1020_v49 = vpop.permute.xlu0 %1019 }
 0x155   : > { %v1224_v57 = vmul.f32 %v1171_v3, %v1114_v11  ;;  %v918_v38 = vadd.f32 %v902_v59, %v793_v24  ;;  %v721_v16 = vadd.f32 %v705_v56, %v2300_v40  ;;  %v757_v43 = vadd.f32 %v741_v17, %v2303_v41  ;;  %v1025_v41 = vpop.permute.xlu1 %1024 }
 0x156   : > { %v1079_v8 = vadd.f32 %v1063_v22, %v880_v23  ;;  %v933_v9 = vrot.slane %v845_v58, 7  ;;  %v778_v14 = vmul.f32 %v2284_v31, %v2397_v5  ;;  %v830_v4 = vmul.f32 %v2286_v32, %v2397_v5 }
 0x157   : > { %1720 = vmatmul.mubr.f32.gmra.mxu1 %v1239_v26  ;;  %v1097_v33 = vrot.slane %v918_v38, 1  ;;  %v866_v44 = vmul.f32 %v2292_v36, %v2397_v5  ;;  %v903_v2 = vmul.f32 %v2294_v37, %v2427_v0  ;;  %v582_v40 = vmul.f32 %v2277_v27, %v2411_v20 }
 0x158   : > { %v1240_v29 = vadd.f32 %v1224_v57, %v1079_v8  ;;  %v953_v61 = vsel %vm944_vm1, %v932_v55, %v933_v9  ;;  %v794_v60 = vadd.f32 %v778_v14, %v654_v53  ;;  %v846_v19 = vadd.f32 %v830_v4, %v721_v16  ;;  %v1181_v53 = vpop.permute.xlu0 %1180 }
 0x159   : > { %v1064_v63 = vmul.f32 %v2535_v54, %v953_v61  ;;  %v1113_v23 = vsel %vm1105_vm0, %v1096_v21, %v1097_v33  ;;  %v882_v62 = vadd.f32 %v866_v44, %v757_v43  ;;  %v618_v7 = vmul.f32 %v2279_v28, %v2411_v20  ;;  %v1186_v22 = vpop.permute.xlu1 %1185 }
 0x15a   : > { %1722 = vmatprep.mubr.f32.mxu1 %v1240_v29  ;;  %v1225_v51 = vmul.f32 %v1176_v13, %v1113_v23  ;;  %v919_v3 = vadd.f32 %v903_v2, %v794_v60  ;;  %v934_v26 = vrot.slane %v846_v19, 7  ;;  %v655_v50 = vmul.f32 %v2282_v30, %v2397_v5 }
 0x15b   : > { %v1080_v59 = vadd.f32 %v1064_v63, %v881_v25  ;;  %v706_v55 = vmul.f32 %v2288_v34, %v2397_v5  ;;  %v742_v54 = vmul.f32 %v2290_v35, %v2397_v5  ;;  %v779_v21 = vmul.f32 %v2284_v31, %v2427_v0 }
 0x15c   : > { %v952_v20 = vsel %vm944_vm1, %v933_v9, %v934_v26  ;;  %v1098_v39 = vrot.slane %v919_v3, 1  ;;  %v831_v13 = vmul.f32 %v2286_v32, %v2427_v0  ;;  %v867_v10 = vmul.f32 %v2292_v36, %v2427_v0  ;;  %v1030_v19 = vpop.permute.xlu0 %1029 }
 0x15d   : > { %v1241_v48 = vadd.f32 %v1225_v51, %v1080_v59  ;;  %v1065_v24 = vmul.f32 %v1020_v49, %v952_v20  ;;  %v722_v56 = vadd.f32 %v706_v55, %v582_v40  ;;  %v758_v17 = vadd.f32 %v742_v54, %v618_v7  ;;  %v1035_v51 = vpop.permute.xlu1 %1034 }
 0x15e   : > { %v1112_v11 = vsel %vm1105_vm0, %v1097_v33, %v1098_v39  ;;  %v795_v58 = vadd.f32 %v779_v21, %v655_v50  ;;  %v904_v25 = vmul.f32 %v2294_v37, %v2416_v52  ;;  %v583_v57 = vmul.f32 %v2277_v27, %v2397_v5 }
 0x15f   : > { %1723 = vmatmul.mubr.f32.gmra.mxu1 %v1241_v48  ;;  %v1081_v38 = vadd.f32 %v1065_v24, %v882_v62  ;;  %v1226_v16 = vmul.f32 %v1181_v53, %v1112_v11  ;;  %v847_v43 = vadd.f32 %v831_v13, %v722_v56  ;;  %v883_v8 = vadd.f32 %v867_v10, %v758_v17 }
 0x160   : > { %v920_v9 = vadd.f32 %v904_v25, %v795_v58  ;;  %v619_v14 = vmul.f32 %v2279_v28, %v2397_v5  ;;  %v656_v4 = vmul.f32 %v2282_v30, %v2427_v0  ;;  %v707_v49 = vmul.f32 %v2288_v34, %v2427_v0  ;;  %v1191_v58 = vpop.permute.xlu0 %1190 }
 0x161   : > { %v1242_v33 = vadd.f32 %v1226_v16, %v1081_v38  ;;  %v935_v44 = vrot.slane %v847_v43, 7  ;;  %v743_v2 = vmul.f32 %v2290_v35, %v2427_v0  ;;  %v780_v40 = vmul.f32 %v2284_v31, %v2416_v52  ;;  %v1196_v43 = vpop.permute.xlu1 %1195 }
 0x162   : > { %v1099_v29 = vrot.slane %v920_v9, 1  ;;  %v723_v61 = vadd.f32 %v707_v49, %v583_v57  ;;  %v832_v60 = vmul.f32 %v2286_v32, %v2416_v52  ;;  %v868_v5 = vmul.f32 %v2292_v36, %v2416_v52 }
 0x163   : > { %1725 = vmatprep.mubr.f32.mxu1 %v1242_v33  ;;  %v951_v63 = vsel %vm944_vm1, %v934_v26, %v935_v44  ;;  %v759_v23 = vadd.f32 %v743_v2, %v619_v14  ;;  %v796_v62 = vadd.f32 %v780_v40, %v656_v4  ;;  %v905_v7 = vmul.f32 %v2294_v37, %v2447_v47 }
 0x164   : > { %v1066_v3 = vmul.f32 %v1025_v41, %v951_v63  ;;  %v1111_v50 = vsel %vm1105_vm0, %v1098_v39, %v1099_v29  ;;  %v848_v59 = vadd.f32 %v832_v60, %v723_v61  ;;  %v584_v55 = vmul.f32 %v2277_v27, %v2427_v0 }
 0x165   : > { %v1227_v54 = vmul.f32 %v1186_v22, %v1111_v50  ;;  %v884_v21 = vadd.f32 %v868_v5, %v759_v23  ;;  %v921_v20 = vadd.f32 %v905_v7, %v796_v62  ;;  %v620_v26 = vmul.f32 %v2279_v28, %v2427_v0  ;;  %v1040_v50 = vpop.permute.xlu0 %1039 }
 0x166   : > { %v1082_v13 = vadd.f32 %v1066_v3, %v883_v8  ;;  %v936_v10 = vrot.slane %v848_v59, 7  ;;  %v657_v53 = vmul.f32 %v2282_v30, %v2416_v52  ;;  %v708_v41 = vmul.f32 %v2288_v34, %v2416_v52 }
 0x167   : > { %v1100_v48 = vrot.slane %v921_v20, 1  ;;  %v744_v39 = vmul.f32 %v2290_v35, %v2416_v52  ;;  %v781_v24 = vmul.f32 %v2284_v31, %v2447_v47  ;;  %v833_v56 = vmul.f32 %v2286_v32, %v2447_v47 }
 0x168   : > { %v1243_v17 = vadd.f32 %v1227_v54, %v1082_v13  ;;  %v950_v0 = vsel %vm944_vm1, %v935_v44, %v936_v10  ;;  %v724_v22 = vadd.f32 %v708_v41, %v584_v55  ;;  %v869_v11 = vmul.f32 %v2292_v36, %v2447_v47 }
 0x169   : > { %v1067_v25 = vmul.f32 %v1030_v19, %v950_v0  ;;  %v1110_v57 = vsel %vm1105_vm0, %v1099_v29, %v1100_v48  ;;  %v760_v38 = vadd.f32 %v744_v39, %v620_v26  ;;  %v797_v16 = vadd.f32 %v781_v24, %v657_v53 }
 0x16a   : > { %1726 = vmatmul.mubr.f32.gmra.mxu1 %v1243_v17  ;;  %v1228_v8 = vmul.f32 %v1191_v58, %v1110_v57  ;;  %v849_v9 = vadd.f32 %v833_v56, %v724_v22  ;;  %v906_v14 = vmul.f32 %v2294_v37, %v2438_v15  ;;  %v585_v33 = vmul.f32 %v2277_v27, %v2416_v52 }
 0x16b   : > { %v1083_v4 = vadd.f32 %v1067_v25, %v884_v21  ;;  %v885_v49 = vadd.f32 %v869_v11, %v760_v38  ;;  %v658_v44 = vmul.f32 %v2282_v30, %v2447_v47  ;;  %v709_v29 = vmul.f32 %v2288_v34, %v2447_v47  ;;  %v1045_v21 = vpop.permute.xlu1 %1044 }
 0x16c   : > { %v922_v2 = vadd.f32 %v906_v14, %v797_v16  ;;  %v937_v40 = vrot.slane %v849_v9, 7  ;;  %v745_v61 = vmul.f32 %v2290_v35, %v2447_v47  ;;  %v621_v5 = vmul.f32 %v2279_v28, %v2416_v52  ;;  %v1201_v16 = vpop.permute.xlu0 %1200 }
 0x16d   : > { %v1244_v60 = vadd.f32 %v1228_v8, %v1083_v4  ;;  %v782_v19 = vmul.f32 %v2284_v31, %v2438_v15  ;;  %v834_v63 = vmul.f32 %v2286_v32, %v2438_v15  ;;  %v725_v7 = vadd.f32 %v709_v29, %v585_v33 }
 0x16e   : > { %v949_v23 = vsel %vm944_vm1, %v936_v10, %v937_v40  ;;  %v1101_v62 = vrot.slane %v922_v2, 1  ;;  %v870_v3 = vmul.f32 %v2292_v36, %v2438_v15  ;;  %v761_v55 = vadd.f32 %v745_v61, %v621_v5 }
 0x16f   : > { %1728 = vmatprep.mubr.f32.mxu1 %v1244_v60  ;;  %v1068_v59 = vmul.f32 %v1035_v51, %v949_v23  ;;  %v798_v54 = vadd.f32 %v782_v19, %v658_v44  ;;  %v907_v52 = vmul.f32 %v2294_v37, %v2463_v12  ;;  %v850_v26 = vadd.f32 %v834_v63, %v725_v7  ;;  %v1206_v4 = vpop.permute.xlu1 %1205 }
 0x170   : > { %v1109_v20 = vsel %vm1105_vm0, %v1100_v48, %v1101_v62  ;;  %v586_v13 = vmul.f32 %v2277_v27, %v2447_v47  ;;  %v622_v10 = vmul.f32 %v2279_v28, %v2447_v47  ;;  %v659_v51 = vmul.f32 %v2282_v30, %v2438_v15 }
 0x171   : > { %v1084_v53 = vadd.f32 %v1068_v59, %v885_v49  ;;  %v1229_v41 = vmul.f32 %v1196_v43, %v1109_v20  ;;  %v923_v39 = vadd.f32 %v907_v52, %v798_v54  ;;  %v938_v24 = vrot.slane %v850_v26, 7 }
 0x172   : > { %v710_v56 = vmul.f32 %v2288_v34, %v2438_v15  ;;  %v746_v48 = vmul.f32 %v2290_v35, %v2438_v15  ;;  %v783_v17 = vmul.f32 %v2284_v31, %v2463_v12  ;;  %v835_v47 = vmul.f32 %v2286_v32, %v2463_v12 }
 0x173   : > { %v1245_v0 = vadd.f32 %v1229_v41, %v1084_v53  ;;  %v1102_v22 = vrot.slane %v923_v39, 1  ;;  %v871_v11 = vmul.f32 %v2292_v36, %v2463_v12  ;;  %v948_v58 = vsel %vm944_vm1, %v937_v40, %v938_v24  ;;  %v1055_v52 = vpop.permute.xlu1 %1054 }
 0x174   : > { %v726_v25 = vadd.f32 %v710_v56, %v586_v13  ;;  %v762_v57 = vadd.f32 %v746_v48, %v622_v10  ;;  %v799_v38 = vadd.f32 %v783_v17, %v659_v51  ;;  %v886_v43 = vadd.f32 %v870_v3, %v761_v55 }
 0x175   : > { %1729 = vmatmul.mubr.f32.gmra.mxu1 %v1245_v0  ;;  %v1069_v8 = vmul.f32 %v1040_v50, %v948_v58  ;;  %v1108_v9 = vsel %vm1105_vm0, %v1101_v62, %v1102_v22  ;;  %v908_v14 = vmul.f32 %v2294_v37, %v2454_v6  ;;  %v587_v2 = vmul.f32 %v2277_v27, %v2438_v15  ;;  %v1050_v50 = vpop.permute.xlu0 %1049 }
 0x176   : > { %v1230_v49 = vmul.f32 %v1201_v16, %v1108_v9  ;;  %v851_v33 = vadd.f32 %v835_v47, %v726_v25  ;;  %v887_v44 = vadd.f32 %v871_v11, %v762_v57  ;;  %v660_v61 = vmul.f32 %v2282_v30, %v2463_v12  ;;  %v2743_v11 = vld [vmem:[%s2839_s5] ss:$0 sm:$0xff] }
 0x177   : > { %v1085_v40 = vadd.f32 %v1069_v8, %v886_v43  ;;  %v924_v29 = vadd.f32 %v908_v14, %v799_v38  ;;  %v711_v60 = vmul.f32 %v2288_v34, %v2463_v12  ;;  %v623_v19 = vmul.f32 %v2279_v28, %v2438_v15  ;;  %v1216_v17 = vpop.permute.xlu1 %1215 }
 0x178   : > { %v939_v5 = vrot.slane %v851_v33, 7  ;;  %v747_v37 = vmul.f32 %v2290_v35, %v2463_v12  ;;  %v784_v63 = vmul.f32 %v2284_v31, %v2454_v6  ;;  %v836_v7 = vmul.f32 %v2286_v32, %v2454_v6 }
 0x179   : > { %v1246_v23 = vadd.f32 %v1230_v49, %v1085_v40  ;;  %v1103_v27 = vrot.slane %v924_v29, 1  ;;  %v727_v62 = vadd.f32 %v711_v60, %v587_v2  ;;  %v624_v15 = vmul.f32 %v2279_v28, %v2463_v12  ;;  %v1211_v48 = vpop.permute.xlu0 %1210 }
 0x17a   : > { %v947_v30 = vsel %vm944_vm1, %v938_v24, %v939_v5  ;;  %v763_v34 = vadd.f32 %v747_v37, %v623_v19  ;;  %v800_v3 = vadd.f32 %v784_v63, %v660_v61  ;;  %v748_v54 = vmul.f32 %v2290_v35, %v2454_v6 }
 0x17b   : > { %1731 = vmatprep.mubr.f32.mxu1 %v1246_v23  ;;  %v1070_v59 = vmul.f32 %v1045_v21, %v947_v30  ;;  %v1107_v31 = vsel %vm1105_vm0, %v1102_v22, %v1103_v27  ;;  %v852_v55 = vadd.f32 %v836_v7, %v727_v62  ;;  %v872_v20 = vmul.f32 %v2292_v36, %v2454_v6  ;;  %v2855_v6 = vld [vmem:[#allocation10_spill] sm:$0xff] }
 0x17c   : > { %v1231_v32 = vmul.f32 %v1206_v4, %v1107_v31  ;;  %v925_v26 = vadd.f32 %v2312_v45, %v800_v3  ;;  %v764_v28 = vadd.f32 %v748_v54, %v624_v15  ;;  %v2856_v24 = vrot.slane %v2855_v6, 1 }
 0x17d   : > { %v1086_v13 = vadd.f32 %v1070_v59, %v887_v44  ;;  %v940_v10 = vrot.slane %v852_v55, 7  ;;  %v888_v12 = vadd.f32 %v872_v20, %v763_v34 }
 0x17e   : > { %v1104_v53 = vrot.slane %v925_v26, 1  ;;  %v889_v39 = vadd.f32 %v2315_v46, %v764_v28 }
 0x17f   : > { %v1247_v21 = vadd.f32 %v1231_v32, %v1086_v13  ;;  %v946_v41 = vsel %vm944_vm1, %v939_v5, %v940_v10  ;;  %v945_v35 = vsel %vm944_vm1, %v940_v10, %v941_v42 }
 0x180   : > { %v1071_v51 = vmul.f32 %v1050_v50, %v946_v41  ;;  %v1106_v36 = vsel %vm1105_vm0, %v1103_v27, %v1104_v53  ;;  %v1072_v45 = vmul.f32 %v1055_v52, %v945_v35  ;;  %v1121_v56 = vsel %vm1105_vm0, %v1104_v53, %v2856_v24 }
 0x181   : > { %1732 = vmatmul.mubr.f32.gmra.mxu1 %v1247_v21  ;;  %v1232_v0 = vmul.f32 %v1211_v48, %v1106_v36  ;;  %v1233_v22 = vmul.f32 %v1216_v17, %v1121_v56 }
 0x182   : > { %v1087_v46 = vadd.f32 %v1071_v51, %v888_v12  ;;  %v1088_v1 = vadd.f32 %v1072_v45, %v889_v39 }
 0x184   : > { %v1248_v47 = vadd.f32 %v1232_v0, %v1087_v46  ;;  %v1249_v42 = vadd.f32 %v1233_v22, %v1088_v1 }
 0x186   : > { %1734 = vmatprep.mubr.f32.mxu1 %v1248_v47 }
 0x187   : > { %1735 = vmatmul.mubr.f32.gmra.mxu1 %v1249_v42 }
 0x20f   : > { %v1715_v58 = vpop.f32.mrf.mxu1 }
 0x210   : > { %v1345_v18 = vadd.f32 %v1715_v58, %v2743_v11 }
 0x211   : > { %v1339_v25 = vpop.f32.mrf.mxu1 }
 0x212   : > { %v1419_v57 = vmax.f32 %v1345_v18, 0.0  ;;  %v1340_v38 = vadd.f32 %v2743_v11, %v1339_v25 }
 0x213   : > { %v1718_v16 = vpop.f32.mrf.mxu1 }
 0x214   : > { %1435 = vst [vmem:[%s2749_s12 + $0x8] sm:$0xff] %v1419_v57  ;;  %v1418_v43 = vmax.f32 %v1340_v38, 0.0  ;;  %v1355_v8 = vadd.f32 %v1718_v16, %v2743_v11 }
 0x215   : > { %v1349_v9 = vpop.f32.mrf.mxu1 }
 0x216   : > { %1434 = vst [vmem:[%s2749_s12] sm:$0xff] %v1418_v43  ;;  %v1421_v14 = vmax.f32 %v1355_v8, 0.0  ;;  %v1350_v4 = vadd.f32 %v2743_v11, %v1349_v9 }
 0x217   : > { %v1721_v49 = vpop.f32.mrf.mxu1 }
 0x218   : > { %1437 = vst [vmem:[%s2749_s12 + $0x18] sm:$0xff] %v1421_v14  ;;  %v1420_v33 = vmax.f32 %v1350_v4, 0.0  ;;  %v1365_v44 = vadd.f32 %v1721_v49, %v2743_v11 }
 0x219   : > { %v1359_v2 = vpop.f32.mrf.mxu1 }
 0x21a   : > { %1436 = vst [vmem:[%s2749_s12 + $0x10] sm:$0xff] %v1420_v33  ;;  %v1423_v40 = vmax.f32 %v1365_v44, 0.0  ;;  %v1360_v29 = vadd.f32 %v2743_v11, %v1359_v2 }
 0x21c   : > { %1439 = vst [vmem:[%s2749_s12 + $0x28] sm:$0xff] %v1423_v40  ;;  %v1422_v61 = vmax.f32 %v1360_v29, 0.0 }
 0x21e   : > { %1438 = vst [vmem:[%s2749_s12 + $0x20] sm:$0xff] %v1422_v61 }
 0x21f   : > { %v1724_v60 = vpop.f32.mrf.mxu1 }
 0x220   : > { %v1375_v5 = vadd.f32 %v1724_v60, %v2743_v11 }
 0x221   : > { %v1369_v19 = vpop.f32.mrf.mxu1 }
 0x222   : > { %v1425_v37 = vmax.f32 %v1375_v5, 0.0  ;;  %v1370_v63 = vadd.f32 %v2743_v11, %v1369_v19 }
 0x224   : > { %1441 = vst [vmem:[%s2749_s12 + $0x38] sm:$0xff] %v1425_v37  ;;  %v1424_v23 = vmax.f32 %v1370_v63, 0.0 }
 0x226   : > { %1440 = vst [vmem:[%s2749_s12 + $0x30] sm:$0xff] %v1424_v23 }
 0x22a   : > { %v1727_v27 = vpop.f32.mrf.mxu1 }
 0x22b   : > { %v1385_v62 = vadd.f32 %v1727_v27, %v2743_v11 }
 0x22c   : > { %v1379_v7 = vpop.f32.mrf.mxu1 }
 0x22d   : > { %v1427_v30 = vmax.f32 %v1385_v62, 0.0  ;;  %v1380_v34 = vadd.f32 %v2743_v11, %v1379_v7 }
 0x22f   : > { %1443 = vst [vmem:[%s2749_s12 + $0x48] sm:$0xff] %v1427_v30  ;;  %v1426_v3 = vmax.f32 %v1380_v34, 0.0 }
 0x231   : > { %1442 = vst [vmem:[%s2749_s12 + $0x40] sm:$0xff] %v1426_v3 }
 0x235   : > { %v1730_v15 = vpop.f32.mrf.mxu1 }
 0x236   : > { %v1395_v50 = vadd.f32 %v1730_v15, %v2743_v11 }
 0x237   : > { %v1389_v59 = vpop.f32.mrf.mxu1 }
 0x238   : > { %v1429_v31 = vmax.f32 %v1395_v50, 0.0  ;;  %v1390_v55 = vadd.f32 %v2743_v11, %v1389_v59 }
 0x23a   : > { %1445 = vst [vmem:[%s2749_s12 + $0x58] sm:$0xff] %v1429_v31  ;;  %v1428_v54 = vmax.f32 %v1390_v55, 0.0 }
 0x23c   : > { %1444 = vst [vmem:[%s2749_s12 + $0x50] sm:$0xff] %v1428_v54 }
 0x241   : > { %v1733_v52 = vpop.f32.mrf.mxu1 }
 0x242   : > { %v1405_v32 = vadd.f32 %v1733_v52, %v2743_v11 }
 0x243   : > { %v1399_v20 = vpop.f32.mrf.mxu1 }
 0x244   : > { %v1431_v26 = vmax.f32 %v1405_v32, 0.0  ;;  %v1400_v13 = vadd.f32 %v2743_v11, %v1399_v20 }
 0x246   : > { %1447 = vst [vmem:[%s2749_s12 + $0x68] sm:$0xff] %v1431_v26  ;;  %v1430_v10 = vmax.f32 %v1400_v13, 0.0 }
 0x247   : > { %v1736_v28 = vpop.f32.mrf.mxu1 }
 0x248   : > { %1446 = vst [vmem:[%s2749_s12 + $0x60] sm:$0xff] %v1430_v10  ;;  %v1415_v12 = vadd.f32 %v1736_v28, %v2743_v11 }
 0x249   : > { %v1409_v53 = vpop.f32.mrf.mxu1 }
 0x24a   : > { %v1433_v21 = vmax.f32 %v1415_v12, 0.0  ;;  %v1410_v41 = vadd.f32 %v2743_v11, %v1409_v53 }
 0x24c   : > { %1449 = vst [vmem:[%s2749_s12 + $0x78] sm:$0xff] %v1433_v21  ;;  %v1432_v39 = vmax.f32 %v1410_v41, 0.0 }
 0x24e   : > { %1448 = vst [vmem:[%s2749_s12 + $0x70] sm:$0xff] %v1432_v39 }
 0x24f   : > { %1834 = shalt.err (!%p1831_p10)
}
 0x250   : > { %s1847_s25 = scalar_lea.hbm %s2780_s24, 2176  ;;  %s1839_s26 = scalar_lea.hbm %s2842_s8, 8192 }
 0x251   : > { %p1836_p0 = scmp.ne.s32.totalorder %s2787_s9, %s1847_s25  ;;  %p1840_p1 = scmp.lt.s32.totalorder %s2787_s9, %s2842_s8 }
 0x252   : > { %p1841_p3 = scmp.lt.s32.totalorder %s1839_s26, %s1847_s25 }
 0x253   : > { %p1837_p2 = pnand %p1836_p0, %p2857_p12 }
 0x254   : > { %p1842_p6 = por %p1841_p3, %p1840_p1 }
 0x255   : > { %p1838_p9 = pneg %p1837_p2 }
 0x257   : > { %p1843_p11 = pnand %p1842_p6, %p1838_p9 }
 0x259   : > { %1846 = shalt.err (!%p1843_p11)
}
 0x25a   : > { %s1894_s14 = smov 128   ;;  %s1895_s24 = smov 256  }
 0x25b   : > { %s1896_s22 = smov 8  }
 0x25c   : > { %1739 = dma.vmem_to_hbm [thread:$0]  (%p2857_p12), %s2789_s20, 2048, %s2787_s9, %s1451_s16, %s1894_s14, %s1895_s24, %s1896_s22  }
 0x25d PF: > { %s1481_s21 = sand.u32 1, %s1874_s27   ;;  %p2858_p13 = scmp.ne.s32.totalorder %s2851_s18, 0 }
 0x25e   : > { %p2859_p4 = scmp.ge.s32.totalorder %s1886_s30, 2  ;;  %s1482_s15 = scalar_lea.sflag [#allocation5], %s1481_s21 }
 0x260   : > { %p1746_p5 = pnand %p2859_p4, %p2858_p13 }
 0x262   : > { %p1747_p7 = pneg %p1746_p5 }
 0x264   : > { %1869 = dma.done.wait (%p1747_p7), %s1482_s15, 2048  }
 0x265   : > { %1871 = vsyncadd (%p1747_p7), %s1482_s15, 4294965248  ;;  %s2860_s25 = sld [smem:[#allocation9_spill]]  ;;  %p21_p8 = scmp.ge.s32.totalorder %s1967_s11, 4  }
 0x266   : > { %s2861_s27 = smov %s1878_s28  ;;  %s2862_s28 = smov %s1882_s29 }
 0x267   : > { %s2864_s30 = smov %s1967_s11  ;;  %23 = sbr.rel (!%p21_p8) target bundleno = 5 (0x5), region = 100 }
 0x26b   : > { %s2863_s29 = smov %s2860_s25 }
 0x26c   :  { %1487 = vsyncpa [#allocation4], 1 }
 0x26d   :  { %1489 = vsyncpa [#allocation4 + $0x1], 1 }
 0x26e   :  { %1490 = vsyncpa [#allocation5], 1 }
 0x26f   :  { %1492 = vsyncpa [#allocation5 + $0x1], 1 }

</bundles_post_ra>
